<compile_context>
chip_gen: v6e
topology: v6e:2x2x1
jax: 0.10.0
libtpu: 0.0.40
codegen_flags: <defaults>
</compile_context>

<pallas_src>
import functools

import jax
import jax.numpy as jnp
import numpy as np
from jax.experimental import pallas as pl
from jax.experimental.pallas import tpu as pltpu

H = 128          # hidden size of fc_visual and fc_audio
D_VIS = 1280     # visual input feature dim
D_AUD = 128      # audio input feature dim


# ----------------------------------------------------------------------------
# Fused kernel: both modalities for one batch block.
#   per modality: h = relu(x @ W1 + b1); a = sigmoid(<h, w_att> + b_att);
#                 w = softmax(a over T);  emb = sum_t h[t] * w[t]
# x arrives flattened as (Bb*T, D_in) f32; cast to bf16 in VMEM for the MXU.
# ----------------------------------------------------------------------------
def fused_branch_kernel(xv_ref, xa_ref,
                        wv_ref, bv_ref, wav_ref,
                        wa_ref, ba_ref, waa_ref,
                        batt_ref,
                        v_emb_ref, a_emb_ref):
    Bb, Hh = v_emb_ref.shape

    def branch(x_ref, w1_ref, b1_ref, watt_ref, b_att, out_ref):
        T = x_ref.shape[0] // Bb
        # In-kernel f32 -> bf16 cast (VPU-cheap); MXU matmul with f32 acc.
        x = x_ref[...].astype(jnp.bfloat16)
        h = jnp.dot(x, w1_ref[...], preferred_element_type=jnp.float32)
        h = jnp.maximum(h + b1_ref[...], 0.0)                    # (Bb*T, H) relu
        # dropout(p=0.5): identity in eval mode
        h3 = h.reshape(Bb, T, Hh)                                # tile-aligned (T=8)

        # Attention logit: Linear(H, 1) as VPU multiply + lane reduce -> (Bb, T),
        # then sigmoid (EUP).  Keep the whole softmax 2-D with T in lanes.
        att = jax.nn.sigmoid(jnp.sum(h3 * watt_ref[...], axis=-1) + b_att)
        # softmax over T (PyTorch dim=1); sigmoid output is bounded, so no
        # max-subtraction needed; divide goes to the EUP as an approx reciprocal.
        e = jnp.exp(att)                                         # (Bb, T)
        w = e * pl.reciprocal(jnp.sum(e, axis=-1, keepdims=True), approx=True)

        # bmm(h.T, w).squeeze(2) == weighted sum over T -> lane-dense (Bb, H) store.
        out_ref[...] = jnp.sum(h3 * w[..., None], axis=1)

    branch(xv_ref, wv_ref, bv_ref, wav_ref, batt_ref[0], v_emb_ref)
    branch(xa_ref, wa_ref, ba_ref, waa_ref, batt_ref[1], a_emb_ref)


def _fused_call(xv, xa, p, Bb):
    """One pallas_call over a batch grid with block size Bb (must divide B)."""
    B, T_V, _ = xv.shape
    _, T_A, _ = xa.shape
    # (B, T, D) -> (B*T, D): contiguous merge of leading dims (no data movement);
    # gives the MXU a tall-M matmul inside the kernel.
    xv2 = xv.reshape(B * T_V, D_VIS)
    xa2 = xa.reshape(B * T_A, D_AUD)

    cost = pl.CostEstimate(
        flops=2 * B * (T_V * D_VIS + T_A * D_AUD) * H,
        transcendentals=3 * B * (T_V + T_A),
        bytes_accessed=(4 * (xv2.size + xa2.size)            # f32 activations
                        + 2 * (D_VIS + D_AUD) * H            # bf16 weights
                        + 4 * (4 * H + 2)                    # biases
                        + 4 * 2 * B * H),                    # f32 outputs
    )

    v_emb, a_emb = pl.pallas_call(
        fused_branch_kernel,
        out_shape=(jax.ShapeDtypeStruct((B, H), jnp.float32),
                   jax.ShapeDtypeStruct((B, H), jnp.float32)),
        grid_spec=pltpu.PrefetchScalarGridSpec(
            num_scalar_prefetch=0,
            grid=(B // Bb,),
            in_specs=[
                pl.BlockSpec((Bb * T_V, D_VIS), lambda i: (i, 0)),  # x_visual (f32)
                pl.BlockSpec((Bb * T_A, D_AUD), lambda i: (i, 0)),  # x_audio  (f32)
                pl.BlockSpec((D_VIS, H), lambda i: (0, 0)),         # W_vis (bf16, resident)
                pl.BlockSpec((1, H), lambda i: (0, 0)),             # b_vis
                pl.BlockSpec((1, H), lambda i: (0, 0)),             # w_att_vis
                pl.BlockSpec((D_AUD, H), lambda i: (0, 0)),         # W_aud (bf16, resident)
                pl.BlockSpec((1, H), lambda i: (0, 0)),             # b_aud
                pl.BlockSpec((1, H), lambda i: (0, 0)),             # w_att_aud
                pl.BlockSpec(memory_space=pltpu.MemorySpace.SMEM),  # [b_att_v, b_att_a]
            ],
            out_specs=[pl.BlockSpec((Bb, H), lambda i: (i, 0)),
                       pl.BlockSpec((Bb, H), lambda i: (i, 0))],
        ),
        compiler_params=pltpu.CompilerParams(
            dimension_semantics=("parallel",)),
        cost_estimate=cost,
    )(xv2, xa2, p["w_vis"], p["b_vis"], p["w_att_vis"],
      p["w_aud"], p["b_aud"], p["w_att_aud"], p["b_att"])
    return v_emb, a_emb


def _pick_block_b(B, block_b):
    """Largest multiple of 8 that divides B and is <= block_b, else None."""
    bb = (min(block_b, B) // 8) * 8
    while bb >= 8:
        if B % bb == 0:
            return bb
        bb -= 8
    return None


def fused_attention_pair(xv, xa, p, *, block_b=128):
    """Visual+audio attention branches for one pair: (B,T,D) -> two (B,H)."""
    B = xv.shape[0]
    if B <= block_b:
        return _fused_call(xv, xa, p, B)          # single block == full array dims
    bb = _pick_block_b(B, block_b)
    if bb is not None:
        return _fused_call(xv, xa, p, bb)
    # No clean divisor: main blocks + one short tail call (avoids a jnp.pad HBM
    # round trip of the bandwidth-bound x tensors and wasted padded compute).
    Bm = (B // block_b) * block_b
    vm, am = _fused_call(xv[:Bm], xa[:Bm], p, block_b)
    vt, at = _fused_call(xv[Bm:], xa[Bm:], p, B - Bm)
    return (jnp.concatenate([vm, vt], axis=0),
            jnp.concatenate([am, at], axis=0))


# ----------------------------------------------------------------------------
# fc_fusion on [v_emb | a_emb | pair_id]  (257 -> 1), plain XLA.
# ----------------------------------------------------------------------------
def fusion_jax(v_emb, a_emb, pid, wf_vis, wf_aud, wf_id, bf):
    return (jnp.sum(v_emb * wf_vis, axis=-1, keepdims=True)
            + jnp.sum(a_emb * wf_aud, axis=-1, keepdims=True)
            + pid * wf_id[0, 0] + bf[0, 0])                      # (B, 1)


# ----------------------------------------------------------------------------
# Parameter init (deterministic, mimics torch.nn.Linear U(-1/sqrt(fan_in), ...)).
# The big Linear weights are stored bf16 once here (not re-cast per forward).
# ----------------------------------------------------------------------------
def init_params(key):
    ks = jax.random.split(key, 10)

    def linear(kw, kb, fan_in, fan_out):
        bound = 1.0 / np.sqrt(fan_in)
        w = jax.random.uniform(kw, (fan_in, fan_out), jnp.float32, -bound, bound)
        b = jax.random.uniform(kb, (fan_out,), jnp.float32, -bound, bound)
        return w, b

    p = {}
    w, b = linear(ks[0], ks[1], D_VIS, H)
    p["w_vis"], p["b_vis"] = w.astype(jnp.bfloat16), b.reshape(1, H)
    w, b = linear(ks[2], ks[3], D_AUD, H)
    p["w_aud"], p["b_aud"] = w.astype(jnp.bfloat16), b.reshape(1, H)
    w, bv = linear(ks[4], ks[5], H, 1)
    p["w_att_vis"] = w.reshape(1, H)
    w, ba = linear(ks[6], ks[7], H, 1)
    p["w_att_aud"] = w.reshape(1, H)
    p["b_att"] = jnp.concatenate([bv, ba]).astype(jnp.float32)   # (2,) -> SMEM
    w, b = linear(ks[8], ks[9], 257, 1)
    wf = w.reshape(257)
    p["wf_vis"] = wf[:H].reshape(1, H)
    p["wf_aud"] = wf[H:2 * H].reshape(1, H)
    p["wf_id"] = wf[2 * H:].reshape(1, 1)
    p["bf"] = b.reshape(1, 1)
    return p


# ----------------------------------------------------------------------------
# Full RankNet forward (eval mode)
# ----------------------------------------------------------------------------
def ranknet_forward(params, x_visual1, x_audio1, x_visual2, x_audio2, pair_id,
                    *, block_b=128):
    p = params
    v1, a1 = fused_attention_pair(x_visual1, x_audio1, p, block_b=block_b)
    v2, a2 = fused_attention_pair(x_visual2, x_audio2, p, block_b=block_b)

    pid = pair_id.reshape(-1, 1).astype(jnp.float32)   # torch.unsqueeze(pair_id, 1)
    y1 = fusion_jax(v1, a1, pid, p["wf_vis"], p["wf_aud"], p["wf_id"], p["bf"])
    y2 = fusion_jax(v2, a2, pid, p["wf_vis"], p["wf_aud"], p["wf_id"], p["bf"])
    ctr = jax.nn.sigmoid(y1 - y2)
    return ctr, y1, y2


# ----------------------------------------------------------------------------
# Pure-JAX reference (same bf16-in / f32-acc matmul precision so the comparison
# tolerance stays tight; softmax via jax.nn.softmax, exact division).
# ----------------------------------------------------------------------------
def _ref_branch(x, w1_bf16, b1, wa, ba_scalar):
    h = jnp.dot(x.astype(jnp.bfloat16), w1_bf16, preferred_element_type=jnp.float32)
    h = jnp.maximum(h + b1, 0.0)                                   # (B, T, H)
    att = jax.nn.sigmoid(jnp.einsum("bth,h->bt", h, wa.reshape(-1)) + ba_scalar)
    w = jax.nn.softmax(att, axis=1)[..., None]                     # (B, T, 1)
    return jnp.sum(h * w, axis=1)                                  # (B, H)


def _ref_forward(p, xv1, xa1, xv2, xa2, pid):
    v1 = _ref_branch(xv1, p["w_vis"], p["b_vis"], p["w_att_vis"], p["b_att"][0])
    a1 = _ref_branch(xa1, p["w_aud"], p["b_aud"], p["w_att_aud"], p["b_att"][1])
    v2 = _ref_branch(xv2, p["w_vis"], p["b_vis"], p["w_att_vis"], p["b_att"][0])
    a2 = _ref_branch(xa2, p["w_aud"], p["b_aud"], p["w_att_aud"], p["b_att"][1])
    c1 = jnp.concatenate([v1, a1, pid.reshape(-1, 1)], axis=1)
    c2 = jnp.concatenate([v2, a2, pid.reshape(-1, 1)], axis=1)
    wf = jnp.concatenate([p["wf_vis"].reshape(-1), p["wf_aud"].reshape(-1),
                          p["wf_id"].reshape(-1)])
    y1 = c1 @ wf[:, None] + p["bf"][0, 0]
    y2 = c2 @ wf[:, None] + p["bf"][0, 0]
    return jax.nn.sigmoid(y1 - y2), y1, y2


if __name__ == "__main__":
    key = jax.random.PRNGKey(0)
    kp, k1, k2, k3, k4, k5 = jax.random.split(key, 6)

    B, T_V, T_A = 2, 8, 8
    params = init_params(kp)
    x_visual1 = jax.random.normal(k1, (B, T_V, D_VIS), jnp.float32)
    x_audio1 = jax.random.normal(k2, (B, T_A, D_AUD), jnp.float32)
    x_visual2 = jax.random.normal(k3, (B, T_V, D_VIS), jnp.float32)
    x_audio2 = jax.random.normal(k4, (B, T_A, D_AUD), jnp.float32)
    pair_id = jax.random.normal(k5, (B,), jnp.float32)

    fwd = jax.jit(functools.partial(ranknet_forward, block_b=128))
    ctr, y1, y2 = fwd(params, x_visual1, x_audio1, x_visual2, x_audio2, pair_id)
    jax.block_until_ready((ctr, y1, y2))

    rctr, ry1, ry2 = _ref_forward(params, x_visual1, x_audio1,
                                  x_visual2, x_audio2, pair_id)
    np.testing.assert_allclose(np.asarray(ctr), np.asarray(rctr), rtol=3e-3, atol=3e-3)
    np.testing.assert_allclose(np.asarray(y1), np.asarray(ry1), rtol=3e-3, atol=3e-3)
    np.testing.assert_allclose(np.asarray(y2), np.asarray(ry2), rtol=3e-3, atol=3e-3)

    print("KERNEL_OK")
</pallas_src>

<mosaic_0001>
module attributes {stable_mosaic.version = 11 : i64} {
  func.func @fused_branch_kernel(%arg0: i32, %arg1: memref<16x1280xf32, #tpu.memory_space<vmem>>, %arg2: memref<16x128xf32, #tpu.memory_space<vmem>>, %arg3: memref<1280x128xbf16, #tpu.memory_space<vmem>>, %arg4: memref<1x128xf32, #tpu.memory_space<vmem>>, %arg5: memref<1x128xf32, #tpu.memory_space<vmem>>, %arg6: memref<128x128xbf16, #tpu.memory_space<vmem>>, %arg7: memref<1x128xf32, #tpu.memory_space<vmem>>, %arg8: memref<1x128xf32, #tpu.memory_space<vmem>>, %arg9: memref<2xf32, #tpu.memory_space<smem>>, %arg10: memref<2x128xf32, #tpu.memory_space<vmem>>, %arg11: memref<2x128xf32, #tpu.memory_space<vmem>>) attributes {dimension_semantics = [#tpu.dimension_semantics<parallel>], iteration_bounds = array<i64: 1>, scalar_prefetch = 0 : i64, scratch_operands = 0 : i64, tpu.core_type = #tpu.core_type<tc>, window_params = [{transform_indices = @transform_0, window_bounds = array<i64: 16, 1280>}, {transform_indices = @transform_1, window_bounds = array<i64: 16, 128>}, {pipeline_mode = #tpu.pipeline_mode<synchronous>, transform_indices = @transform_2, window_bounds = array<i64: 1280, 128>}, {pipeline_mode = #tpu.pipeline_mode<synchronous>, transform_indices = @transform_3, window_bounds = array<i64: 1, 128>}, {pipeline_mode = #tpu.pipeline_mode<synchronous>, transform_indices = @transform_4, window_bounds = array<i64: 1, 128>}, {pipeline_mode = #tpu.pipeline_mode<synchronous>, transform_indices = @transform_5, window_bounds = array<i64: 128, 128>}, {pipeline_mode = #tpu.pipeline_mode<synchronous>, transform_indices = @transform_6, window_bounds = array<i64: 1, 128>}, {pipeline_mode = #tpu.pipeline_mode<synchronous>, transform_indices = @transform_7, window_bounds = array<i64: 1, 128>}, {transform_indices = @transform_8, window_bounds = array<i64: 2>}, {transform_indices = @transform_9, window_bounds = array<i64: 2, 128>}, {transform_indices = @transform_10, window_bounds = array<i64: 2, 128>}]} {
    %c0 = arith.constant 0 : index
    %0 = memref.load %arg9[%c0] : memref<2xf32, #tpu.memory_space<smem>>
    %c0_0 = arith.constant 0 : index
    %c0_1 = arith.constant 0 : index
    %1 = vector.load %arg1[%c0_0, %c0_1] : memref<16x1280xf32, #tpu.memory_space<vmem>>, vector<16x1280xf32>
    %2 = arith.truncf %1 : vector<16x1280xf32> to vector<16x1280xbf16>
    %c0_2 = arith.constant 0 : index
    %c0_3 = arith.constant 0 : index
    %3 = vector.load %arg3[%c0_2, %c0_3] : memref<1280x128xbf16, #tpu.memory_space<vmem>>, vector<1280x128xbf16>
    %cst = arith.constant dense<0.000000e+00> : vector<16x128xf32>
    %4 = tpu.matmul %2, %3, %cst {dimension_numbers = #tpu.dot_dimension_numbers<[1], [0], [0], [1], [0, 0, 1, 1], [], []>} : vector<16x1280xbf16>, vector<1280x128xbf16>, vector<16x128xf32> -> vector<16x128xf32>
    %c0_4 = arith.constant 0 : index
    %c0_5 = arith.constant 0 : index
    %5 = vector.load %arg4[%c0_4, %c0_5] : memref<1x128xf32, #tpu.memory_space<vmem>>, vector<1x128xf32>
    %6 = vector.broadcast %5 : vector<1x128xf32> to vector<16x128xf32>
    %7 = arith.addf %4, %6 : vector<16x128xf32>
    %cst_6 = arith.constant 0.000000e+00 : f32
    %8 = vector.broadcast %cst_6 : f32 to vector<16x128xf32>
    %9 = arith.maximumf %7, %8 : vector<16x128xf32>
    %10 = vector.shape_cast %9 : vector<16x128xf32> to vector<2x8x128xf32>
    %c0_7 = arith.constant 0 : index
    %c0_8 = arith.constant 0 : index
    %11 = vector.load %arg5[%c0_7, %c0_8] : memref<1x128xf32, #tpu.memory_space<vmem>>, vector<1x128xf32>
    %12 = vector.shape_cast %11 : vector<1x128xf32> to vector<1x1x128xf32>
    %13 = vector.broadcast %12 : vector<1x1x128xf32> to vector<2x8x128xf32>
    %14 = arith.mulf %10, %13 : vector<2x8x128xf32>
    %cst_9 = arith.constant dense<0.000000e+00> : vector<2x8xf32>
    %15 = vector.multi_reduction <add>, %14, %cst_9 [2] : vector<2x8x128xf32> to vector<2x8xf32>
    %16 = vector.broadcast %0 : f32 to vector<2x8xf32>
    %17 = arith.addf %15, %16 : vector<2x8xf32>
    %18 = arith.negf %17 : vector<2x8xf32>
    %19 = math.exp %18 : vector<2x8xf32>
    %cst_10 = arith.constant 1.000000e+00 : f32
    %20 = vector.broadcast %cst_10 : f32 to vector<2x8xf32>
    %21 = arith.addf %20, %19 : vector<2x8xf32>
    %22 = arith.divf %20, %21 : vector<2x8xf32>
    %23 = math.exp %22 : vector<2x8xf32>
    %cst_11 = arith.constant dense<0.000000e+00> : vector<2xf32>
    %24 = vector.multi_reduction <add>, %23, %cst_11 [1] : vector<2x8xf32> to vector<2xf32>
    %25 = vector.shape_cast %24 : vector<2xf32> to vector<2x1xf32>
    %26 = tpu.reciprocal %25 {approx = true} : vector<2x1xf32> -> vector<2x1xf32>
    %27 = vector.broadcast %26 : vector<2x1xf32> to vector<2x8xf32>
    %28 = arith.mulf %23, %27 : vector<2x8xf32>
    %29 = vector.shape_cast %28 : vector<2x8xf32> to vector<2x8x1xf32>
    %30 = vector.broadcast %29 : vector<2x8x1xf32> to vector<2x8x128xf32>
    %31 = arith.mulf %10, %30 : vector<2x8x128xf32>
    %cst_12 = arith.constant dense<0.000000e+00> : vector<2x128xf32>
    %32 = vector.multi_reduction <add>, %31, %cst_12 [1] : vector<2x8x128xf32> to vector<2x128xf32>
    %c0_13 = arith.constant 0 : index
    %c0_14 = arith.constant 0 : index
    %33 = vector.load %arg10[%c0_13, %c0_14] : memref<2x128xf32, #tpu.memory_space<vmem>>, vector<2x128xf32>
    tpu.vector_store %arg10[%c0_13, %c0_14], %32 {strides = array<i32>} : memref<2x128xf32, #tpu.memory_space<vmem>>, vector<2x128xf32>,
    %c1 = arith.constant 1 : index
    %34 = memref.load %arg9[%c1] : memref<2xf32, #tpu.memory_space<smem>>
    %c0_15 = arith.constant 0 : index
    %c0_16 = arith.constant 0 : index
    %35 = vector.load %arg2[%c0_15, %c0_16] : memref<16x128xf32, #tpu.memory_space<vmem>>, vector<16x128xf32>
    %36 = arith.truncf %35 : vector<16x128xf32> to vector<16x128xbf16>
    %c0_17 = arith.constant 0 : index
    %c0_18 = arith.constant 0 : index
    %37 = vector.load %arg6[%c0_17, %c0_18] : memref<128x128xbf16, #tpu.memory_space<vmem>>, vector<128x128xbf16>
    %cst_19 = arith.constant dense<0.000000e+00> : vector<16x128xf32>
    %38 = tpu.matmul %36, %37, %cst_19 {dimension_numbers = #tpu.dot_dimension_numbers<[1], [0], [0], [1], [0, 0, 1, 1], [], []>} : vector<16x128xbf16>, vector<128x128xbf16>, vector<16x128xf32> -> vector<16x128xf32>
    %c0_20 = arith.constant 0 : index
    %c0_21 = arith.constant 0 : index
    %39 = vector.load %arg7[%c0_20, %c0_21] : memref<1x128xf32, #tpu.memory_space<vmem>>, vector<1x128xf32>
    %40 = vector.broadcast %39 : vector<1x128xf32> to vector<16x128xf32>
    %41 = arith.addf %38, %40 : vector<16x128xf32>
    %cst_22 = arith.constant 0.000000e+00 : f32
    %42 = vector.broadcast %cst_22 : f32 to vector<16x128xf32>
    %43 = arith.maximumf %41, %42 : vector<16x128xf32>
    %44 = vector.shape_cast %43 : vector<16x128xf32> to vector<2x8x128xf32>
    %c0_23 = arith.constant 0 : index
    %c0_24 = arith.constant 0 : index
    %45 = vector.load %arg8[%c0_23, %c0_24] : memref<1x128xf32, #tpu.memory_space<vmem>>, vector<1x128xf32>
    %46 = vector.shape_cast %45 : vector<1x128xf32> to vector<1x1x128xf32>
    %47 = vector.broadcast %46 : vector<1x1x128xf32> to vector<2x8x128xf32>
    %48 = arith.mulf %44, %47 : vector<2x8x128xf32>
    %cst_25 = arith.constant dense<0.000000e+00> : vector<2x8xf32>
    %49 = vector.multi_reduction <add>, %48, %cst_25 [2] : vector<2x8x128xf32> to vector<2x8xf32>
    %50 = vector.broadcast %34 : f32 to vector<2x8xf32>
    %51 = arith.addf %49, %50 : vector<2x8xf32>
    %52 = arith.negf %51 : vector<2x8xf32>
    %53 = math.exp %52 : vector<2x8xf32>
    %cst_26 = arith.constant 1.000000e+00 : f32
    %54 = vector.broadcast %cst_26 : f32 to vector<2x8xf32>
    %55 = arith.addf %54, %53 : vector<2x8xf32>
    %56 = arith.divf %54, %55 : vector<2x8xf32>
    %57 = math.exp %56 : vector<2x8xf32>
    %cst_27 = arith.constant dense<0.000000e+00> : vector<2xf32>
    %58 = vector.multi_reduction <add>, %57, %cst_27 [1] : vector<2x8xf32> to vector<2xf32>
    %59 = vector.shape_cast %58 : vector<2xf32> to vector<2x1xf32>
    %60 = tpu.reciprocal %59 {approx = true} : vector<2x1xf32> -> vector<2x1xf32>
    %61 = vector.broadcast %60 : vector<2x1xf32> to vector<2x8xf32>
    %62 = arith.mulf %57, %61 : vector<2x8xf32>
    %63 = vector.shape_cast %62 : vector<2x8xf32> to vector<2x8x1xf32>
    %64 = vector.broadcast %63 : vector<2x8x1xf32> to vector<2x8x128xf32>
    %65 = arith.mulf %44, %64 : vector<2x8x128xf32>
    %cst_28 = arith.constant dense<0.000000e+00> : vector<2x128xf32>
    %66 = vector.multi_reduction <add>, %65, %cst_28 [1] : vector<2x8x128xf32> to vector<2x128xf32>
    %c0_29 = arith.constant 0 : index
    %c0_30 = arith.constant 0 : index
    %67 = vector.load %arg11[%c0_29, %c0_30] : memref<2x128xf32, #tpu.memory_space<vmem>>, vector<2x128xf32>
    tpu.vector_store %arg11[%c0_29, %c0_30], %66 {strides = array<i32>} : memref<2x128xf32, #tpu.memory_space<vmem>>, vector<2x128xf32>,
    return
  }
  func.func @transform_0(%arg0: i32) -> (i32, i32) {
    %c0_i32 = arith.constant 0 : i32
    %c0_i32_0 = arith.constant 0 : i32
    return %arg0, %c0_i32 : i32, i32
  }
  func.func @transform_1(%arg0: i32) -> (i32, i32) {
    %c0_i32 = arith.constant 0 : i32
    %c0_i32_0 = arith.constant 0 : i32
    return %arg0, %c0_i32 : i32, i32
  }
  func.func @transform_2(%arg0: i32) -> (i32, i32) {
    %c0_i32 = arith.constant 0 : i32
    %c0_i32_0 = arith.constant 0 : i32
    %c0_i32_1 = arith.constant 0 : i32
    return %c0_i32, %c0_i32_0 : i32, i32
  }
  func.func @transform_3(%arg0: i32) -> (i32, i32) {
    %c0_i32 = arith.constant 0 : i32
    %c0_i32_0 = arith.constant 0 : i32
    %c0_i32_1 = arith.constant 0 : i32
    return %c0_i32, %c0_i32_0 : i32, i32
  }
  func.func @transform_4(%arg0: i32) -> (i32, i32) {
    %c0_i32 = arith.constant 0 : i32
    %c0_i32_0 = arith.constant 0 : i32
    %c0_i32_1 = arith.constant 0 : i32
    return %c0_i32, %c0_i32_0 : i32, i32
  }
  func.func @transform_5(%arg0: i32) -> (i32, i32) {
    %c0_i32 = arith.constant 0 : i32
    %c0_i32_0 = arith.constant 0 : i32
    %c0_i32_1 = arith.constant 0 : i32
    return %c0_i32, %c0_i32_0 : i32, i32
  }
  func.func @transform_6(%arg0: i32) -> (i32, i32) {
    %c0_i32 = arith.constant 0 : i32
    %c0_i32_0 = arith.constant 0 : i32
    %c0_i32_1 = arith.constant 0 : i32
    return %c0_i32, %c0_i32_0 : i32, i32
  }
  func.func @transform_7(%arg0: i32) -> (i32, i32) {
    %c0_i32 = arith.constant 0 : i32
    %c0_i32_0 = arith.constant 0 : i32
    %c0_i32_1 = arith.constant 0 : i32
    return %c0_i32, %c0_i32_0 : i32, i32
  }
  func.func @transform_8(%arg0: i32) -> i32 {
    %c0_i32 = arith.constant 0 : i32
    %c0_i32_0 = arith.constant 0 : i32
    return %c0_i32 : i32
  }
  func.func @transform_9(%arg0: i32) -> (i32, i32) {
    %c0_i32 = arith.constant 0 : i32
    %c0_i32_0 = arith.constant 0 : i32
    return %arg0, %c0_i32 : i32, i32
  }
  func.func @transform_10(%arg0: i32) -> (i32, i32) {
    %c0_i32 = arith.constant 0 : i32
    %c0_i32_0 = arith.constant 0 : i32
    return %arg0, %c0_i32 : i32, i32
  }
}

module attributes {stable_mosaic.version = 11 : i64} {
  func.func @fused_branch_kernel(%arg0: i32, %arg1: memref<16x1280xf32, #tpu.memory_space<vmem>>, %arg2: memref<16x128xf32, #tpu.memory_space<vmem>>, %arg3: memref<1280x128xbf16, #tpu.memory_space<vmem>>, %arg4: memref<1x128xf32, #tpu.memory_space<vmem>>, %arg5: memref<1x128xf32, #tpu.memory_space<vmem>>, %arg6: memref<128x128xbf16, #tpu.memory_space<vmem>>, %arg7: memref<1x128xf32, #tpu.memory_space<vmem>>, %arg8: memref<1x128xf32, #tpu.memory_space<vmem>>, %arg9: memref<2xf32, #tpu.memory_space<smem>>, %arg10: memref<2x128xf32, #tpu.memory_space<vmem>>, %arg11: memref<2x128xf32, #tpu.memory_space<vmem>>) attributes {dimension_semantics = [#tpu.dimension_semantics<parallel>], iteration_bounds = array<i64: 1>, scalar_prefetch = 0 : i64, scratch_operands = 0 : i64, tpu.core_type = #tpu.core_type<tc>, window_params = [{transform_indices = @transform_0, window_bounds = array<i64: 16, 1280>}, {transform_indices = @transform_1, window_bounds = array<i64: 16, 128>}, {pipeline_mode = #tpu.pipeline_mode<synchronous>, transform_indices = @transform_2, window_bounds = array<i64: 1280, 128>}, {pipeline_mode = #tpu.pipeline_mode<synchronous>, transform_indices = @transform_3, window_bounds = array<i64: 1, 128>}, {pipeline_mode = #tpu.pipeline_mode<synchronous>, transform_indices = @transform_4, window_bounds = array<i64: 1, 128>}, {pipeline_mode = #tpu.pipeline_mode<synchronous>, transform_indices = @transform_5, window_bounds = array<i64: 128, 128>}, {pipeline_mode = #tpu.pipeline_mode<synchronous>, transform_indices = @transform_6, window_bounds = array<i64: 1, 128>}, {pipeline_mode = #tpu.pipeline_mode<synchronous>, transform_indices = @transform_7, window_bounds = array<i64: 1, 128>}, {transform_indices = @transform_8, window_bounds = array<i64: 2>}, {transform_indices = @transform_9, window_bounds = array<i64: 2, 128>}, {transform_indices = @transform_10, window_bounds = array<i64: 2, 128>}]} {
    %c0 = arith.constant 0 : index
    %0 = memref.load %arg9[%c0] : memref<2xf32, #tpu.memory_space<smem>>
    %c0_0 = arith.constant 0 : index
    %c0_1 = arith.constant 0 : index
    %1 = vector.load %arg1[%c0_0, %c0_1] : memref<16x1280xf32, #tpu.memory_space<vmem>>, vector<16x1280xf32>
    %2 = arith.truncf %1 : vector<16x1280xf32> to vector<16x1280xbf16>
    %c0_2 = arith.constant 0 : index
    %c0_3 = arith.constant 0 : index
    %3 = vector.load %arg3[%c0_2, %c0_3] : memref<1280x128xbf16, #tpu.memory_space<vmem>>, vector<1280x128xbf16>
    %cst = arith.constant dense<0.000000e+00> : vector<16x128xf32>
    %4 = tpu.matmul %2, %3, %cst {dimension_numbers = #tpu.dot_dimension_numbers<[1], [0], [0], [1], [0, 0, 1, 1], [], []>} : vector<16x1280xbf16>, vector<1280x128xbf16>, vector<16x128xf32> -> vector<16x128xf32>
    %c0_4 = arith.constant 0 : index
    %c0_5 = arith.constant 0 : index
    %5 = vector.load %arg4[%c0_4, %c0_5] : memref<1x128xf32, #tpu.memory_space<vmem>>, vector<1x128xf32>
    %6 = vector.broadcast %5 : vector<1x128xf32> to vector<16x128xf32>
    %7 = arith.addf %4, %6 : vector<16x128xf32>
    %cst_6 = arith.constant 0.000000e+00 : f32
    %8 = vector.broadcast %cst_6 : f32 to vector<16x128xf32>
    %9 = arith.maximumf %7, %8 : vector<16x128xf32>
    %10 = vector.shape_cast %9 : vector<16x128xf32> to vector<2x8x128xf32>
    %c0_7 = arith.constant 0 : index
    %c0_8 = arith.constant 0 : index
    %11 = vector.load %arg5[%c0_7, %c0_8] : memref<1x128xf32, #tpu.memory_space<vmem>>, vector<1x128xf32>
    %12 = vector.shape_cast %11 : vector<1x128xf32> to vector<1x1x128xf32>
    %13 = vector.broadcast %12 : vector<1x1x128xf32> to vector<2x8x128xf32>
    %14 = arith.mulf %10, %13 : vector<2x8x128xf32>
    %cst_9 = arith.constant dense<0.000000e+00> : vector<2x8xf32>
    %15 = vector.multi_reduction <add>, %14, %cst_9 [2] : vector<2x8x128xf32> to vector<2x8xf32>
    %16 = vector.broadcast %0 : f32 to vector<2x8xf32>
    %17 = arith.addf %15, %16 : vector<2x8xf32>
    %18 = arith.negf %17 : vector<2x8xf32>
    %19 = math.exp %18 : vector<2x8xf32>
    %cst_10 = arith.constant 1.000000e+00 : f32
    %20 = vector.broadcast %cst_10 : f32 to vector<2x8xf32>
    %21 = arith.addf %20, %19 : vector<2x8xf32>
    %22 = arith.divf %20, %21 : vector<2x8xf32>
    %23 = math.exp %22 : vector<2x8xf32>
    %cst_11 = arith.constant dense<0.000000e+00> : vector<2xf32>
    %24 = vector.multi_reduction <add>, %23, %cst_11 [1] : vector<2x8xf32> to vector<2xf32>
    %25 = vector.shape_cast %24 : vector<2xf32> to vector<2x1xf32>
    %26 = tpu.reciprocal %25 {approx = true} : vector<2x1xf32> -> vector<2x1xf32>
    %27 = vector.broadcast %26 : vector<2x1xf32> to vector<2x8xf32>
    %28 = arith.mulf %23, %27 : vector<2x8xf32>
    %29 = vector.shape_cast %28 : vector<2x8xf32> to vector<2x8x1xf32>
    %30 = vector.broadcast %29 : vector<2x8x1xf32> to vector<2x8x128xf32>
    %31 = arith.mulf %10, %30 : vector<2x8x128xf32>
    %cst_12 = arith.constant dense<0.000000e+00> : vector<2x128xf32>
    %32 = vector.multi_reduction <add>, %31, %cst_12 [1] : vector<2x8x128xf32> to vector<2x128xf32>
    %c0_13 = arith.constant 0 : index
    %c0_14 = arith.constant 0 : index
    %33 = vector.load %arg10[%c0_13, %c0_14] : memref<2x128xf32, #tpu.memory_space<vmem>>, vector<2x128xf32>
    tpu.vector_store %arg10[%c0_13, %c0_14], %32 {strides = array<i32>} : memref<2x128xf32, #tpu.memory_space<vmem>>, vector<2x128xf32>,
    %c1 = arith.constant 1 : index
    %34 = memref.load %arg9[%c1] : memref<2xf32, #tpu.memory_space<smem>>
    %c0_15 = arith.constant 0 : index
    %c0_16 = arith.constant 0 : index
    %35 = vector.load %arg2[%c0_15, %c0_16] : memref<16x128xf32, #tpu.memory_space<vmem>>, vector<16x128xf32>
    %36 = arith.truncf %35 : vector<16x128xf32> to vector<16x128xbf16>
    %c0_17 = arith.constant 0 : index
    %c0_18 = arith.constant 0 : index
    %37 = vector.load %arg6[%c0_17, %c0_18] : memref<128x128xbf16, #tpu.memory_space<vmem>>, vector<128x128xbf16>
    %cst_19 = arith.constant dense<0.000000e+00> : vector<16x128xf32>
    %38 = tpu.matmul %36, %37, %cst_19 {dimension_numbers = #tpu.dot_dimension_numbers<[1], [0], [0], [1], [0, 0, 1, 1], [], []>} : vector<16x128xbf16>, vector<128x128xbf16>, vector<16x128xf32> -> vector<16x128xf32>
    %c0_20 = arith.constant 0 : index
    %c0_21 = arith.constant 0 : index
    %39 = vector.load %arg7[%c0_20, %c0_21] : memref<1x128xf32, #tpu.memory_space<vmem>>, vector<1x128xf32>
    %40 = vector.broadcast %39 : vector<1x128xf32> to vector<16x128xf32>
    %41 = arith.addf %38, %40 : vector<16x128xf32>
    %cst_22 = arith.constant 0.000000e+00 : f32
    %42 = vector.broadcast %cst_22 : f32 to vector<16x128xf32>
    %43 = arith.maximumf %41, %42 : vector<16x128xf32>
    %44 = vector.shape_cast %43 : vector<16x128xf32> to vector<2x8x128xf32>
    %c0_23 = arith.constant 0 : index
    %c0_24 = arith.constant 0 : index
    %45 = vector.load %arg8[%c0_23, %c0_24] : memref<1x128xf32, #tpu.memory_space<vmem>>, vector<1x128xf32>
    %46 = vector.shape_cast %45 : vector<1x128xf32> to vector<1x1x128xf32>
    %47 = vector.broadcast %46 : vector<1x1x128xf32> to vector<2x8x128xf32>
    %48 = arith.mulf %44, %47 : vector<2x8x128xf32>
    %cst_25 = arith.constant dense<0.000000e+00> : vector<2x8xf32>
    %49 = vector.multi_reduction <add>, %48, %cst_25 [2] : vector<2x8x128xf32> to vector<2x8xf32>
    %50 = vector.broadcast %34 : f32 to vector<2x8xf32>
    %51 = arith.addf %49, %50 : vector<2x8xf32>
    %52 = arith.negf %51 : vector<2x8xf32>
    %53 = math.exp %52 : vector<2x8xf32>
    %cst_26 = arith.constant 1.000000e+00 : f32
    %54 = vector.broadcast %cst_26 : f32 to vector<2x8xf32>
    %55 = arith.addf %54, %53 : vector<2x8xf32>
    %56 = arith.divf %54, %55 : vector<2x8xf32>
    %57 = math.exp %56 : vector<2x8xf32>
    %cst_27 = arith.constant dense<0.000000e+00> : vector<2xf32>
    %58 = vector.multi_reduction <add>, %57, %cst_27 [1] : vector<2x8xf32> to vector<2xf32>
    %59 = vector.shape_cast %58 : vector<2xf32> to vector<2x1xf32>
    %60 = tpu.reciprocal %59 {approx = true} : vector<2x1xf32> -> vector<2x1xf32>
    %61 = vector.broadcast %60 : vector<2x1xf32> to vector<2x8xf32>
    %62 = arith.mulf %57, %61 : vector<2x8xf32>
    %63 = vector.shape_cast %62 : vector<2x8xf32> to vector<2x8x1xf32>
    %64 = vector.broadcast %63 : vector<2x8x1xf32> to vector<2x8x128xf32>
    %65 = arith.mulf %44, %64 : vector<2x8x128xf32>
    %cst_28 = arith.constant dense<0.000000e+00> : vector<2x128xf32>
    %66 = vector.multi_reduction <add>, %65, %cst_28 [1] : vector<2x8x128xf32> to vector<2x128xf32>
    %c0_29 = arith.constant 0 : index
    %c0_30 = arith.constant 0 : index
    %67 = vector.load %arg11[%c0_29, %c0_30] : memref<2x128xf32, #tpu.memory_space<vmem>>, vector<2x128xf32>
    tpu.vector_store %arg11[%c0_29, %c0_30], %66 {strides = array<i32>} : memref<2x128xf32, #tpu.memory_space<vmem>>, vector<2x128xf32>,
    return
  }
  func.func @transform_0(%arg0: i32) -> (i32, i32) {
    %c0_i32 = arith.constant 0 : i32
    %c0_i32_0 = arith.constant 0 : i32
    return %arg0, %c0_i32 : i32, i32
  }
  func.func @transform_1(%arg0: i32) -> (i32, i32) {
    %c0_i32 = arith.constant 0 : i32
    %c0_i32_0 = arith.constant 0 : i32
    return %arg0, %c0_i32 : i32, i32
  }
  func.func @transform_2(%arg0: i32) -> (i32, i32) {
    %c0_i32 = arith.constant 0 : i32
    %c0_i32_0 = arith.constant 0 : i32
    %c0_i32_1 = arith.constant 0 : i32
    return %c0_i32, %c0_i32_0 : i32, i32
  }
  func.func @transform_3(%arg0: i32) -> (i32, i32) {
    %c0_i32 = arith.constant 0 : i32
    %c0_i32_0 = arith.constant 0 : i32
    %c0_i32_1 = arith.constant 0 : i32
    return %c0_i32, %c0_i32_0 : i32, i32
  }
  func.func @transform_4(%arg0: i32) -> (i32, i32) {
    %c0_i32 = arith.constant 0 : i32
    %c0_i32_0 = arith.constant 0 : i32
    %c0_i32_1 = arith.constant 0 : i32
    return %c0_i32, %c0_i32_0 : i32, i32
  }
  func.func @transform_5(%arg0: i32) -> (i32, i32) {
    %c0_i32 = arith.constant 0 : i32
    %c0_i32_0 = arith.constant 0 : i32
    %c0_i32_1 = arith.constant 0 : i32
    return %c0_i32, %c0_i32_0 : i32, i32
  }
  func.func @transform_6(%arg0: i32) -> (i32, i32) {
    %c0_i32 = arith.constant 0 : i32
    %c0_i32_0 = arith.constant 0 : i32
    %c0_i32_1 = arith.constant 0 : i32
    return %c0_i32, %c0_i32_0 : i32, i32
  }
  func.func @transform_7(%arg0: i32) -> (i32, i32) {
    %c0_i32 = arith.constant 0 : i32
    %c0_i32_0 = arith.constant 0 : i32
    %c0_i32_1 = arith.constant 0 : i32
    return %c0_i32, %c0_i32_0 : i32, i32
  }
  func.func @transform_8(%arg0: i32) -> i32 {
    %c0_i32 = arith.constant 0 : i32
    %c0_i32_0 = arith.constant 0 : i32
    return %c0_i32 : i32
  }
  func.func @transform_9(%arg0: i32) -> (i32, i32) {
    %c0_i32 = arith.constant 0 : i32
    %c0_i32_0 = arith.constant 0 : i32
    return %arg0, %c0_i32 : i32, i32
  }
  func.func @transform_10(%arg0: i32) -> (i32, i32) {
    %c0_i32 = arith.constant 0 : i32
    %c0_i32_0 = arith.constant 0 : i32
    return %arg0, %c0_i32 : i32, i32
  }
}

</mosaic_0001>

<bundles_post_ra>
// kernel: ranknet_forward.3
= control target key start
LH: loop header
LB: loop body
LE: loop exit
PB: predicated region body
PF: predicated region fallthrough
CT: control target
= control target key end

     0   :  { %16 = vsyncpa [#allocation3], 0  ;;  %s1879_s0 = inlined_call_operand.hbm [shape: f32[16,1280], index: 0, kind: input, shape index: {}]   ;;  %s1880_s1 = inlined_call_operand.vmem [shape: f32[16,128], index: 1, kind: input, shape index: {}]   ;;  %s1881_s2 = inlined_call_operand.hbm [shape: bf16[1280,128], index: 2, kind: input, shape index: {}]   ;;  %s1882_s3 = inlined_call_operand.vmem [shape: f32[1,128], index: 3, kind: input, shape index: {}]   ;;  %s1883_s4 = inlined_call_operand.vmem [shape: f32[1,128], index: 4, kind: input, shape index: {}]   ;;  %s1884_s5 = inlined_call_operand.hbm [shape: bf16[128,128], index: 5, kind: input, shape index: {}]   ;;  %s1885_s6 = inlined_call_operand.vmem [shape: f32[1,128], index: 6, kind: input, shape index: {}]   ;;  %s1886_s7 = inlined_call_operand.vmem [shape: f32[1,128], index: 7, kind: input, shape index: {}]   ;;  %s1887_s8 = inlined_call_operand.vmem [shape: f32[2], index: 8, kind: input, shape index: {}]   ;;  %s1888_s9 = inlined_call_operand.vmem [shape: f32[2,128], index: 9, kind: output, shape index: {0}]   ;;  %s1889_s10 = inlined_call_operand.vmem [shape: f32[2,128], index: 10, kind: output, shape index: {1}]  }
   0x1   :  { %17 = vsyncpa [#allocation6], 0 }
   0x2   :  { %18 = vsyncpa [#allocation4], 0  ;;  %s1730_s13 = smov [#allocation5]  }
   0x3   :  { %s38_s14 = sshll.u32 %s1730_s13, 4  ;;  %s39_s14 = int_to_ptr.vmem [resolvable:$true] %s38_s14 }
   0x4   :  { %s1660_s15 = scalar_lea.vmem %s39_s14, 10240  ;;  %p1665_p1 = scmp.lt.s32.totalorder %s39_s14, %s39_s14 }
   0x5   :  { %p1661_p0 = scmp.ne.s32.totalorder %s39_s14, %s1660_s15  ;;  %p1666_p2 = scmp.lt.s32.totalorder %s1660_s15, %s1660_s15 }
   0x7   :  { %p1667_p3 = por %p1666_p2, %p1665_p1 }
   0x9   :  { %p1668_p4 = pnand %p1667_p3, %p1661_p0 }
   0xb   :  { %1671 = shalt.err (!%p1668_p4)
}
   0xc   :  { %s1731_s16 = smov 64   ;;  %s1732_s17 = smov 4  }
   0xd   :  { %44 = dma.hbm_to_vmem [thread:$0]  %s1881_s2, 10240, %s39_s14, [#allocation6], %s1731_s16, %s1731_s16, %s1732_s17  }
   0xe   :  { %s1733_s20 = smov [#allocation2]  }
   0xf   :  { %s24_s21 = sshll.u32 %s1733_s20, 4  ;;  %s25_s21 = int_to_ptr.vmem [resolvable:$true] %s24_s21 }
  0x10   :  { %s1680_s22 = scalar_lea.vmem %s25_s21, 2560  ;;  %p1685_p6 = scmp.lt.s32.totalorder %s25_s21, %s25_s21 }
  0x11   :  { %p1681_p5 = scmp.ne.s32.totalorder %s25_s21, %s1680_s22  ;;  %p1686_p7 = scmp.lt.s32.totalorder %s1680_s22, %s1680_s22 }
  0x13   :  { %p1687_p8 = por %p1686_p7, %p1685_p6 }
  0x15   :  { %p1688_p9 = pnand %p1687_p8, %p1681_p5 }
  0x17   :  { %1691 = shalt.err (!%p1688_p9)
}
  0x18   :  { %s1734_s23 = smov 1280   ;;  %s1735_s24 = smov 80  }
  0x19   :  { %30 = dma.hbm_to_vmem [thread:$0]  %s1879_s0, 2560, %s25_s21, [#allocation3], %s1734_s23, %s1734_s23, %s1735_s24  }
  0x1a   :  { %s71_s2 = sshll.u32 %s1887_s8, 4  ;;  %s1736_s29 = smov [#allocation7]   ;;  %s72_s2 = int_to_ptr.vmem [resolvable:$true] %s71_s2 }
  0x1b   :  { %s54_s30 = sshll.u32 %s1736_s29, 4  ;;  %s55_s30 = int_to_ptr.vmem [resolvable:$true] %s54_s30 }
  0x1c   :  { %s1700_s11 = scalar_lea.vmem %s55_s30, 1024  ;;  %p1705_p11 = scmp.lt.s32.totalorder %s55_s30, %s55_s30 }
  0x1d   :  { %p1701_p10 = scmp.ne.s32.totalorder %s55_s30, %s1700_s11  ;;  %p1706_p12 = scmp.lt.s32.totalorder %s1700_s11, %s1700_s11 }
  0x1f   :  { %p1707_p13 = por %p1706_p12, %p1705_p11 }
  0x21   :  { %p1708_p0 = pnand %p1707_p13, %p1701_p10 }
  0x23   :  { %1711 = shalt.err (!%p1708_p0)
}
  0x24   :  { %60 = dma.hbm_to_vmem [thread:$0]  %s1884_s5, 1024, %s55_s30, [#allocation6], %s1731_s16, %s1731_s16, %s1732_s17  }
  0x25   :  { %s1712_s13 = scalar_lea.vmem %s72_s2, 16  ;;  %p1717_p2 = scmp.lt.s32.totalorder %s72_s2, %s72_s2 }
  0x26   :  { %p1713_p1 = scmp.ne.s32.totalorder %s72_s2, %s1712_s13  ;;  %p1718_p3 = scmp.lt.s32.totalorder %s1712_s13, %s1712_s13 }
  0x28   :  { %p1719_p4 = por %p1718_p3, %p1717_p2 }
  0x2a   :  { %p1720_p5 = pnand %p1719_p4, %p1713_p1 }
  0x2c   :  { %1723 = shalt.err (!%p1720_p5)
}
  0x2d   :  { %s1737_s8 = smov [#allocation8]  }
  0x2e   :  { %74 = dma.vmem_to_smem %s72_s2, 16, %s1737_s8, [#allocation4]  }
  0x2f   :  { %1724 = dma.done.wait [#allocation3], 2560  }
  0x30   :  { %1725 = vsyncadd [#allocation3], 4294964736 }
  0x31   :  { %1726 = dma.done.wait [#allocation6], 11264  }
  0x32   :  { %1727 = vsyncadd [#allocation6], 4294956032 }
  0x33   :  { %1728 = dma.done.wait [#allocation4], 16  }
  0x34   :  { %1729 = vsyncadd [#allocation4], 4294967280 }
  0x35   :  { %87 = sfence }
  0x36   :  { %v1536_v0 = vld [vmem:[#allocation5 + $0x78] sm:$0xff]   ;;  %v1540_v4 = vld [vmem:[#allocation5 + $0x70] sm:$0xff]   ;;  %v1544_v8 = vld [vmem:[#allocation5 + $0x68] sm:$0xff]   ;;  %vm1739_vm0 = vmmov 0   ;;  %vm1018_vm1 = vcmask 1041409   ;;  %vm1021_vm2 = vcmask 58368  }
  0x37   :  { %v1537_v1 = vld [vmem:[#allocation5 + $0xf8] sm:$0xff]   ;;  %1384 = vmatprep.subr.bf16.mxu0 %v1536_v0  ;;  %v1541_v5 = vld [vmem:[#allocation5 + $0xf0] sm:$0xff]   ;;  %v1545_v9 = vld [vmem:[#allocation5 + $0xe8] sm:$0xff]  }
  0x38   :  { %v1538_v2 = vld [vmem:[#allocation5 + $0x38] sm:$0xff]   ;;  %1406 = vmatprep.subr.bf16.mxu1 %v1537_v1  ;;  %v1542_v6 = vld [vmem:[#allocation5 + $0x30] sm:$0xff]   ;;  %v1546_v10 = vld [vmem:[#allocation5 + $0x28] sm:$0xff]  }
  0x39   :  { %v1539_v3 = vld [vmem:[#allocation5 + $0xb8] sm:$0xff]   ;;  %1385 = vmatpush3.bf16.msra.mxu0 %v1538_v2  ;;  %v1543_v7 = vld [vmem:[#allocation5 + $0xb0] sm:$0xff]   ;;  %v1547_v11 = vld [vmem:[#allocation5 + $0xa8] sm:$0xff]  }
  0x3a   :  { %1407 = vmatpush3.bf16.msra.mxu1 %v1539_v3  ;;  %1386 = vmatprep.subr.bf16.mxu0 %v1540_v4  ;;  %v1548_v12 = vld [vmem:[#allocation5 + $0x60] sm:$0xff]   ;;  %v1552_v16 = vld [vmem:[#allocation5 + $0x58] sm:$0xff]   ;;  %v1556_v20 = vld [vmem:[#allocation5 + $0x50] sm:$0xff]  }
  0x3b   :  { %1408 = vmatprep.subr.bf16.mxu1 %v1541_v5  ;;  %v1549_v13 = vld [vmem:[#allocation5 + $0xe0] sm:$0xff]   ;;  %v1553_v17 = vld [vmem:[#allocation5 + $0xd8] sm:$0xff]   ;;  %v1557_v21 = vld [vmem:[#allocation5 + $0xd0] sm:$0xff]  }
  0x3c   :  { %v1550_v14 = vld [vmem:[#allocation5 + $0x20] sm:$0xff]   ;;  %v1554_v18 = vld [vmem:[#allocation5 + $0x18] sm:$0xff]   ;;  %v1558_v22 = vld [vmem:[#allocation5 + $0x10] sm:$0xff]  }
  0x3d   :  { %1387 = vmatpush3.bf16.msra.mxu0 %v1542_v6  ;;  %v1551_v15 = vld [vmem:[#allocation5 + $0xa0] sm:$0xff]   ;;  %v1555_v19 = vld [vmem:[#allocation5 + $0x98] sm:$0xff]   ;;  %v1559_v23 = vld [vmem:[#allocation5 + $0x90] sm:$0xff]  }
  0x3e   :  { %1409 = vmatpush3.bf16.msra.mxu1 %v1543_v7  ;;  %1388 = vmatprep.subr.bf16.mxu0 %v1544_v8  ;;  %v1560_v24 = vld [vmem:[#allocation5 + $0x48] sm:$0xff]   ;;  %v1564_v28 = vld [vmem:[#allocation5 + $0x40] sm:$0xff]   ;;  %v101_v33 = vld [vmem:[#allocation2 + $0x58] sm:$0xff] }
  0x3f   :  { %1410 = vmatprep.subr.bf16.mxu1 %v1545_v9  ;;  %v1561_v25 = vld [vmem:[#allocation5 + $0xc8] sm:$0xff]   ;;  %v1565_v29 = vld [vmem:[#allocation5 + $0xc0] sm:$0xff]   ;;  %v93_v34 = vld [vmem:[#allocation2 + $0x18] sm:$0xff] }
  0x40   :  { %v1562_v26 = vld [vmem:[#allocation5 + $0x8] sm:$0xff]   ;;  %v1566_v30 = vld [vmem:[#allocation5] sm:$0xff]   ;;  %v100_v38 = vld [vmem:[#allocation2 + $0x50] sm:$0xff] }
  0x41   :  { %1389 = vmatpush3.bf16.msra.mxu0 %v1546_v10  ;;  %v1563_v27 = vld [vmem:[#allocation5 + $0x88] sm:$0xff]   ;;  %v1567_v31 = vld [vmem:[#allocation5 + $0x80] sm:$0xff]   ;;  %v92_v41 = vld [vmem:[#allocation2 + $0x10] sm:$0xff] }
  0x42   :  { %1411 = vmatpush3.bf16.msra.mxu1 %v1547_v11  ;;  %1390 = vmatprep.subr.bf16.mxu0 %v1548_v12  ;;  %v91_v32 = vld [vmem:[#allocation2 + $0x8] sm:$0xff]  ;;  %v90_v37 = vld [vmem:[#allocation2] sm:$0xff]  ;;  %v1568_v44 = vld [vmem:[#allocation5 + $0x178] sm:$0xff]  }
  0x43   :  { %1412 = vmatprep.subr.bf16.mxu1 %v1549_v13  ;;  %v111_v35 = vpack.c.bf16 %v101_v33, %v91_v32  ;;  %v103_v36 = vld [vmem:[#allocation2 + $0x68] sm:$0xff]  ;;  %v110_v40 = vpack.c.bf16 %v100_v38, %v90_v37  ;;  %v102_v42 = vld [vmem:[#allocation2 + $0x60] sm:$0xff]  ;;  %v1569_v45 = vld [vmem:[#allocation5 + $0x1f8] sm:$0xff]  }
  0x44   :  { %v113_v39 = vpack.c.bf16 %v103_v36, %v93_v34  ;;  %v112_v43 = vpack.c.bf16 %v102_v42, %v92_v41  ;;  %v1570_v46 = vld [vmem:[#allocation5 + $0x138] sm:$0xff]   ;;  %v1572_v48 = vld [vmem:[#allocation5 + $0x170] sm:$0xff]   ;;  %v1576_v52 = vld [vmem:[#allocation5 + $0x168] sm:$0xff]  }
  0x45   :  { %1391 = vmatpush3.bf16.msra.mxu0 %v1550_v14  ;;  %799 = vmatprep.mubr.bf16.mxu0 %v111_v35  ;;  %v1571_v47 = vld [vmem:[#allocation5 + $0x1b8] sm:$0xff]   ;;  %v1573_v49 = vld [vmem:[#allocation5 + $0x1f0] sm:$0xff]   ;;  %v1577_v53 = vld [vmem:[#allocation5 + $0x1e8] sm:$0xff]  }
  0x46   :  { %1413 = vmatpush3.bf16.msra.mxu1 %v1551_v15  ;;  %1392 = vmatprep.subr.bf16.mxu0 %v1552_v16  ;;  %v1574_v50 = vld [vmem:[#allocation5 + $0x130] sm:$0xff]   ;;  %v1578_v54 = vld [vmem:[#allocation5 + $0x128] sm:$0xff]   ;;  %v1580_v56 = vld [vmem:[#allocation5 + $0x160] sm:$0xff]  }
  0x47   :  { %1414 = vmatprep.subr.bf16.mxu1 %v1553_v17  ;;  %840 = vmatprep.mubr.bf16.mxu1 %v113_v39  ;;  %v1575_v51 = vld [vmem:[#allocation5 + $0x1b0] sm:$0xff]   ;;  %v1579_v55 = vld [vmem:[#allocation5 + $0x1a8] sm:$0xff]   ;;  %v1581_v57 = vld [vmem:[#allocation5 + $0x1e0] sm:$0xff]  }
  0x48   :  { %v1582_v58 = vld [vmem:[#allocation5 + $0x120] sm:$0xff]   ;;  %v1584_v60 = vld [vmem:[#allocation5 + $0x158] sm:$0xff]   ;;  %v1588_v0 = vld [vmem:[#allocation5 + $0x150] sm:$0xff]  }
  0x49   :  { %1393 = vmatpush3.bf16.msra.mxu0 %v1554_v18  ;;  %v1583_v59 = vld [vmem:[#allocation5 + $0x1a0] sm:$0xff]   ;;  %v1585_v61 = vld [vmem:[#allocation5 + $0x1d8] sm:$0xff]   ;;  %v1589_v1 = vld [vmem:[#allocation5 + $0x1d0] sm:$0xff]  }
  0x4a   :  { %1415 = vmatpush3.bf16.msra.mxu1 %v1555_v19  ;;  %1394 = vmatprep.subr.bf16.mxu0 %v1556_v20  ;;  %v1586_v62 = vld [vmem:[#allocation5 + $0x118] sm:$0xff]   ;;  %v1590_v2 = vld [vmem:[#allocation5 + $0x110] sm:$0xff]   ;;  %v1592_v4 = vld [vmem:[#allocation5 + $0x148] sm:$0xff]  }
  0x4b   :  { %1416 = vmatprep.subr.bf16.mxu1 %v1557_v21  ;;  %v1587_v63 = vld [vmem:[#allocation5 + $0x198] sm:$0xff]   ;;  %v1591_v3 = vld [vmem:[#allocation5 + $0x190] sm:$0xff]   ;;  %v1593_v5 = vld [vmem:[#allocation5 + $0x1c8] sm:$0xff]  }
  0x4c   :  { %v1594_v6 = vld [vmem:[#allocation5 + $0x108] sm:$0xff]   ;;  %v1596_v8 = vld [vmem:[#allocation5 + $0x140] sm:$0xff]   ;;  %v105_v13 = vld [vmem:[#allocation2 + $0x78] sm:$0xff] }
  0x4d   :  { %1395 = vmatpush3.bf16.msra.mxu0 %v1558_v22  ;;  %v1595_v7 = vld [vmem:[#allocation5 + $0x188] sm:$0xff]   ;;  %v1597_v9 = vld [vmem:[#allocation5 + $0x1c0] sm:$0xff]   ;;  %v97_v14 = vld [vmem:[#allocation2 + $0x38] sm:$0xff] }
  0x4e   :  { %1417 = vmatpush3.bf16.msra.mxu1 %v1559_v23  ;;  %1396 = vmatprep.subr.bf16.mxu0 %v1560_v24  ;;  %v1598_v10 = vld [vmem:[#allocation5 + $0x100] sm:$0xff]   ;;  %v95_v12 = vld [vmem:[#allocation2 + $0x28] sm:$0xff]  ;;  %v104_v19 = vld [vmem:[#allocation2 + $0x70] sm:$0xff]  ;;  %v1738_v23 = vmov 0.0  }
  0x4f   :  { %1418 = vmatprep.subr.bf16.mxu1 %v1561_v25  ;;  %v1599_v11 = vld [vmem:[#allocation5 + $0x180] sm:$0xff]   ;;  %v107_v15 = vld [vmem:[#allocation2 + $0x88] sm:$0xff]  ;;  %v115_v16 = vpack.c.bf16 %v105_v13, %v95_v12  ;;  %v96_v20 = vld [vmem:[#allocation2 + $0x30] sm:$0xff] }
  0x50   :  { %v117_v17 = vpack.c.bf16 %v107_v15, %v97_v14  ;;  %v94_v18 = vld [vmem:[#allocation2 + $0x20] sm:$0xff]  ;;  %v1600_v25 = vld [vmem:[#allocation5 + $0x278] sm:$0xff]   ;;  %v1607_v32 = vld [vmem:[#allocation5 + $0x228] sm:$0xff]  }
  0x51   :  { %1397 = vmatpush3.bf16.msra.mxu0 %v1562_v26  ;;  %v114_v21 = vpack.c.bf16 %v104_v19, %v94_v18  ;;  %v106_v22 = vld [vmem:[#allocation2 + $0x80] sm:$0xff]  ;;  %v1601_v26 = vld [vmem:[#allocation5 + $0x238] sm:$0xff]   ;;  %v1608_v33 = vld [vmem:[#allocation7 + $0x28] sm:$0xff]  }
  0x52   :  { %1419 = vmatpush3.bf16.msra.mxu1 %v1563_v27  ;;  %1398 = vmatprep.subr.bf16.mxu0 %v1564_v28  ;;  %v116_v24 = vpack.c.bf16 %v106_v22, %v96_v20  ;;  %v1602_v27 = vld [vmem:[#allocation7 + $0x38] sm:$0xff]   ;;  %v1603_v28 = vld [vmem:[#allocation5 + $0x270] sm:$0xff]   ;;  %v1609_v34 = vld [vmem:[#allocation5 + $0x260] sm:$0xff]  }
  0x53   :  { %1420 = vmatprep.subr.bf16.mxu1 %v1565_v29  ;;  %v1604_v29 = vld [vmem:[#allocation5 + $0x230] sm:$0xff]   ;;  %v1610_v35 = vld [vmem:[#allocation5 + $0x220] sm:$0xff]   ;;  %v1612_v37 = vld [vmem:[#allocation5 + $0x258] sm:$0xff]  }
  0x54   :  { %v1611_v36 = vld [vmem:[#allocation7 + $0x20] sm:$0xff]   ;;  %v1613_v38 = vld [vmem:[#allocation5 + $0x218] sm:$0xff]   ;;  %v1616_v41 = vld [vmem:[#allocation5 + $0x210] sm:$0xff]  }
  0x55   :  { %1399 = vmatpush3.bf16.msra.mxu0 %v1566_v30  ;;  %v1605_v30 = vld [vmem:[#allocation7 + $0x30] sm:$0xff]   ;;  %v1614_v39 = vld [vmem:[#allocation7 + $0x18] sm:$0xff]  }
  0x56   :  { %1421 = vmatpush3.bf16.msra.mxu1 %v1567_v31  ;;  %1428 = vmatprep.subr.bf16.mxu0 %v1568_v44  ;;  %v1606_v31 = vld [vmem:[#allocation5 + $0x268] sm:$0xff]   ;;  %v1617_v42 = vld [vmem:[#allocation7 + $0x10] sm:$0xff]  }
  0x57   :  { %1450 = vmatprep.subr.bf16.mxu1 %v1569_v45  ;;  %v1619_v44 = vld [vmem:[#allocation5 + $0x208] sm:$0xff]  }
  0x58   :  { %800 = vmatmul.mubr.bf16.vlgmr.msra.gmra.mxu0 %v110_v40  ;;  %v1615_v40 = vld [vmem:[#allocation5 + $0x250] sm:$0xff]   ;;  %v99_v45 = vld [vmem:[#allocation2 + $0x48] sm:$0xff] }
  0x59   :  { %841 = vmatmul.mubr.bf16.vlgmr.msra.gmra.mxu1 %v112_v43  ;;  %1429 = vmatpush3.bf16.msra.mxu0 %v1570_v46  ;;  %v1618_v43 = vld [vmem:[#allocation5 + $0x248] sm:$0xff]   ;;  %v109_v46 = vld [vmem:[#allocation2 + $0x98] sm:$0xff] }
  0x5a   :  { %1451 = vmatpush3.bf16.msra.mxu1 %v1571_v47  ;;  %1430 = vmatprep.subr.bf16.mxu0 %v1572_v48  ;;  %v1620_v47 = vld [vmem:[#allocation7 + $0x8] sm:$0xff]   ;;  %v1621_v48 = vld [vmem:[#allocation5 + $0x240] sm:$0xff]  }
  0x5b   :  { %1452 = vmatprep.subr.bf16.mxu1 %v1573_v49  ;;  %881 = vmatprep.mubr.bf16.mxu0 %v115_v16  ;;  %v119_v49 = vpack.c.bf16 %v109_v46, %v99_v45 }
  0x5c   :  { %922 = vmatprep.mubr.bf16.mxu1 %v117_v17 }
  0x5d   :  { %1431 = vmatpush3.bf16.msra.mxu0 %v1574_v50  ;;  %v1622_v50 = vld [vmem:[#allocation5 + $0x200] sm:$0xff]  }
  0x5e   :  { %1453 = vmatpush3.bf16.msra.mxu1 %v1575_v51  ;;  %1432 = vmatprep.subr.bf16.mxu0 %v1576_v52  ;;  %v98_v51 = vld [vmem:[#allocation2 + $0x40] sm:$0xff]  ;;  %v108_v52 = vld [vmem:[#allocation2 + $0x90] sm:$0xff] }
  0x5f   :  { %1454 = vmatprep.subr.bf16.mxu1 %v1577_v53  ;;  %v1623_v53 = vld [vmem:[#allocation7] sm:$0xff]  }
  0x61   :  { %1433 = vmatpush3.bf16.msra.mxu0 %v1578_v54  ;;  %v1069_v54 = vld [vmem:[%s1880_s1] sm:$0xff] }
  0x62   :  { %1455 = vmatpush3.bf16.msra.mxu1 %v1579_v55  ;;  %1434 = vmatprep.subr.bf16.mxu0 %v1580_v56  ;;  %v1070_v55 = vld [vmem:[%s1880_s1 + $0x8] sm:$0xff]  ;;  %v118_v56 = vpack.c.bf16 %v108_v52, %v98_v51 }
  0x63   :  { %1456 = vmatprep.subr.bf16.mxu1 %v1581_v57  ;;  %v1071_v57 = vpack.c.bf16 %v1070_v55, %v1069_v54 }
  0x65   :  { %1435 = vmatpush3.bf16.msra.mxu0 %v1582_v58 }
  0x66   :  { %1457 = vmatpush3.bf16.msra.mxu1 %v1583_v59  ;;  %1436 = vmatprep.subr.bf16.mxu0 %v1584_v60 }
  0x67   :  { %1458 = vmatprep.subr.bf16.mxu1 %v1585_v61 }
  0x69   :  { %1437 = vmatpush3.bf16.msra.mxu0 %v1586_v62 }
  0x6a   :  { %1459 = vmatpush3.bf16.msra.mxu1 %v1587_v63  ;;  %1438 = vmatprep.subr.bf16.mxu0 %v1588_v0 }
  0x6b   :  { %1460 = vmatprep.subr.bf16.mxu1 %v1589_v1 }
  0x6d   :  { %1439 = vmatpush3.bf16.msra.mxu0 %v1590_v2 }
  0x6e   :  { %1461 = vmatpush3.bf16.msra.mxu1 %v1591_v3  ;;  %1440 = vmatprep.subr.bf16.mxu0 %v1592_v4 }
  0x6f   :  { %1462 = vmatprep.subr.bf16.mxu1 %v1593_v5 }
  0x71   :  { %1441 = vmatpush3.bf16.msra.mxu0 %v1594_v6  ;;  %v1287_v6 = vld [vmem:[%s1882_s3] ss:$0 sm:$0xff] }
  0x72   :  { %1463 = vmatpush3.bf16.msra.mxu1 %v1595_v7  ;;  %1442 = vmatprep.subr.bf16.mxu0 %v1596_v8 }
  0x73   :  { %1464 = vmatprep.subr.bf16.mxu1 %v1597_v9 }
  0x75   :  { %1443 = vmatpush3.bf16.msra.mxu0 %v1598_v10 }
  0x76   :  { %1465 = vmatpush3.bf16.msra.mxu1 %v1599_v11  ;;  %1472 = vmatprep.subr.bf16.mxu0 %v1600_v25 }
  0x77   :  { %1503 = vmatprep.subr.bf16.mxu1 %v1738_v23 }
  0x78   :  { %882 = vmatmul.mubr.bf16.vlgmr.msra.gmra.mxu0 %v114_v21  ;;  %v1372_v21 = vld [vmem:[%s1885_s6] ss:$0 sm:$0xff] }
  0x79   :  { %923 = vmatmul.mubr.bf16.vlgmr.msra.gmra.mxu1 %v116_v24  ;;  %1473 = vmatpush3.bf16.msra.mxu0 %v1601_v26 }
  0x7a   :  { %1519 = vmatprep.mubr.msk.bf16.mxu1 %vm1739_vm0, %v1738_v23  ;;  %1504 = vmatpush3.bf16.msra.mxu1 %v1602_v27 }
  0x7b   :  { %1474 = vmatprep.subr.bf16.mxu0 %v1603_v28  ;;  %1505 = vmatprep.subr.bf16.mxu1 %v1738_v23 }
  0x7c   :  { %963 = vmatprep.mubr.bf16.mxu0 %v119_v49 }
  0x7d   :  { %1475 = vmatpush3.bf16.msra.mxu0 %v1604_v29 }
  0x7e   :  { %1506 = vmatpush3.bf16.msra.mxu1 %v1605_v30  ;;  %1476 = vmatprep.subr.bf16.mxu0 %v1606_v31 }
  0x7f   :  { %1507 = vmatprep.subr.bf16.mxu1 %v1738_v23 }
  0x81   :  { %1477 = vmatpush3.bf16.msra.mxu0 %v1607_v32  ;;  %v1381_v32 = vld [vmem:[%s1886_s7] ss:$0 sm:$0xff]  ;;  %s89_s7 = sld [smem:[#allocation8]] }
  0x82   :  { %1508 = vmatpush3.bf16.msra.mxu1 %v1608_v33  ;;  %1478 = vmatprep.subr.bf16.mxu0 %v1609_v34 }
  0x83   :  { %1509 = vmatprep.subr.bf16.mxu1 %v1738_v23 }
  0x85   :  { %1479 = vmatpush3.bf16.msra.mxu0 %v1610_v35 }
  0x86   :  { %1510 = vmatpush3.bf16.msra.mxu1 %v1611_v36  ;;  %1480 = vmatprep.subr.bf16.mxu0 %v1612_v37 }
  0x87   :  { %1511 = vmatprep.subr.bf16.mxu1 %v1738_v23  ;;  %v987_v55 = vstv %s89_s7 }
  0x89   :  { %1481 = vmatpush3.bf16.msra.mxu0 %v1613_v38 }
  0x8a   :  { %1512 = vmatpush3.bf16.msra.mxu1 %v1614_v39  ;;  %1482 = vmatprep.subr.bf16.mxu0 %v1615_v40 }
  0x8b   :  { %1513 = vmatprep.subr.bf16.mxu1 %v1738_v23 }
  0x8d   :  { %1483 = vmatpush3.bf16.msra.mxu0 %v1616_v41  ;;  %v1368_v41 = vld [vmem:[%s1883_s4] ss:$0 sm:$0xff]  ;;  %s1371_s4 = sld [smem:[#allocation8 + $0x1]] }
  0x8e   :  { %1514 = vmatpush3.bf16.msra.mxu1 %v1617_v42  ;;  %1484 = vmatprep.subr.bf16.mxu0 %v1618_v43 }
  0x8f   :  { %1515 = vmatprep.subr.bf16.mxu1 %v1738_v23 }
  0x91   :  { %1485 = vmatpush3.bf16.msra.mxu0 %v1619_v44 }
  0x92   :  { %1516 = vmatpush3.bf16.msra.mxu1 %v1620_v47  ;;  %1486 = vmatprep.subr.bf16.mxu0 %v1621_v48 }
  0x93   :  { %1517 = vmatprep.subr.bf16.mxu1 %v1738_v23  ;;  %v1199_v52 = vstv %s1371_s4 }
  0x95   :  { %1487 = vmatpush3.bf16.msra.mxu0 %v1622_v50 }
  0x96   :  { %1518 = vmatpush3.bf16.msra.mxu1 %v1623_v53 }
  0x98   :  { %964 = vmatmul.mubr.bf16.vlgmr.msra.gmra.mxu0 %v118_v56 }
  0x99   :  { %1520 = vmatmul.mubr.bf16.vlgmr.msra.gmra.mxu1 %v1071_v57 }
 0x118   :  { %v1400_v58 = vpop.f32.mrf.mxu0 }
 0x119   :  { %v1422_v59 = vpop.f32.mrf.mxu1 }
 0x11a   :  { %v1401_v60 = vpop.f32.mrf.mxu0 }
 0x11b   :  { %v1423_v61 = vpop.f32.mrf.mxu1  ;;  %v1402_v5 = vadd.f32 %v1401_v60, %v1400_v58 }
 0x11c   :  { %v1403_v62 = vpop.f32.mrf.mxu0  ;;  %v1424_v11 = vadd.f32 %v1423_v61, %v1422_v59 }
 0x11d   :  { %v1425_v63 = vpop.f32.mrf.mxu1  ;;  %v802_v9 = vadd.f32 %v1402_v5, %v1287_v6 }
 0x11e   :  { %v1404_v0 = vpop.f32.mrf.mxu0 }
 0x11f   :  { %v1426_v2 = vpop.f32.mrf.mxu1  ;;  %v1405_v10 = vadd.f32 %v1404_v0, %v1403_v62  ;;  %v843_v15 = vadd.f32 %v1424_v11, %v802_v9 }
 0x120   :  { %v1427_v17 = vadd.f32 %v1426_v2, %v1425_v63 }
 0x121   :  { %v805_v16 = vadd.f32 %v1405_v10, %v1287_v6 }
 0x123   :  { %v846_v23 = vadd.f32 %v1427_v17, %v805_v16 }
 0x138   :  { %v1444_v1 = vpop.f32.mrf.mxu0 }
 0x139   :  { %v1466_v3 = vpop.f32.mrf.mxu1 }
 0x13a   :  { %v1445_v4 = vpop.f32.mrf.mxu0 }
 0x13b   :  { %v1467_v7 = vpop.f32.mrf.mxu1  ;;  %v1446_v12 = vadd.f32 %v1445_v4, %v1444_v1 }
 0x13c   :  { %v1447_v8 = vpop.f32.mrf.mxu0  ;;  %v1468_v24 = vadd.f32 %v1467_v7, %v1466_v3 }
 0x13d   :  { %v1469_v13 = vpop.f32.mrf.mxu1  ;;  %v884_v18 = vadd.f32 %v1446_v12, %v843_v15 }
 0x13e   :  { %v1448_v14 = vpop.f32.mrf.mxu0 }
 0x13f   :  { %v1449_v19 = vadd.f32 %v1448_v14, %v1447_v8  ;;  %v1470_v20 = vpop.f32.mrf.mxu1  ;;  %v925_v28 = vadd.f32 %v1468_v24, %v884_v18  ;;  %v1008_v18 = vlaneseq }
 0x140   :  { %v1471_v35 = vadd.f32 %v1470_v20, %v1469_v13 }
 0x141   :  { %v887_v29 = vadd.f32 %v1449_v19, %v846_v23  ;;  %v1009_v19 = vand.u32 127, %v1008_v18  ;;  %v1011_v20 = vshrl.u32 %v1008_v18, 7 }
 0x143   :  { %v928_v42 = vadd.f32 %v1471_v35, %v887_v29 }
 0x158   :  { %v1488_v22 = vpop.f32.mrf.mxu0 }
 0x159   :  { %v1177_v25 = vpop.f32.mrf.mxu1 }
 0x15a   :  { %v1835_v26 = vadd.f32 %v1372_v21, %v1177_v25  ;;  %v1489_v27 = vpop.f32.mrf.mxu0 }
 0x15b   :  { %v1490_v30 = vadd.f32 %v1489_v27, %v1488_v22  ;;  %v1521_v31 = vpop.f32.mrf.mxu1 }
 0x15c   :  { %v1184_v33 = vmax.f32 %v1835_v26, 0.0  ;;  %v1491_v34 = vpop.f32.mrf.mxu0 }
 0x15d   :  { %v1180_v36 = vpop.f32.mrf.mxu1  ;;  %v1841_v37 = vadd.f32 %v1490_v30, %v925_v28 }
 0x15e   :  { %v1843_v38 = vadd.f32 %v1372_v21, %v1180_v36  ;;  %v1492_v39 = vpop.f32.mrf.mxu0  ;;  %v1193_v40 = vmul.f32 %v1381_v32, %v1184_v33  ;;  %v1012_v21 = vsub.s32 %v1009_v19, %v1011_v20  ;;  %v1740_v36 = vmov 0  }
 0x15f   :  { %v1493_v43 = vadd.f32 %v1492_v39, %v1491_v34  ;;  %v1522_v44 = vpop.f32.mrf.mxu1  ;;  %v972_v45 = vmax.f32 %v1841_v37, 0.0  ;;  %1535 = vset.pattern.permute.xlu1 %v1740_v36  ;;  %1534 = vset.pattern.permute.xlu0 %v1740_v36 }
 0x160   :  { %v1185_v46 = vmax.f32 %v1843_v38, 0.0  ;;  %1195 = vadd.xlane.f32.xlu1 %v1193_v40  ;;  %v1033_v44 = vsub.s32 1, %v1011_v20 }
 0x161   :  { %v1852_v47 = vadd.f32 %v1493_v43, %v928_v42  ;;  %v981_v48 = vmul.f32 %v1368_v41, %v972_v45 }
 0x162   :  { %v1194_v49 = vmul.f32 %v1381_v32, %v1185_v46 }
 0x163   :  { %v973_v50 = vmax.f32 %v1852_v47, 0.0  ;;  %983 = vadd.xlane.f32.xlu0 %v981_v48 }
 0x164   :  { %1197 = vadd.xlane.f32.xlu1 %v1194_v49 }
 0x165   :  { %v982_v51 = vmul.f32 %v1368_v41, %v973_v50  ;;  %v1029_v41 = vsub.s32 0, %v1011_v20 }
 0x167   :  { %985 = vadd.xlane.f32.xlu0 %v982_v51 }
 0x1e9   :  { %v1196_v53 = vpop.xlane.xlu1 %1195 }
 0x1ea   :  { %v1200_v54 = vadd.f32 %v1199_v52, %v1196_v53 }
 0x1ec   :  { %v1382_v56 = vmul.f32 -1.442695, %v1200_v54  ;;  %v984_v57 = vpop.xlane.xlu0 %983 }
 0x1ed   :  { %v1198_v58 = vpop.xlane.xlu1 %1197  ;;  %v988_v59 = vadd.f32 %v987_v55, %v984_v57 }
 0x1ee   :  { %1624 = vpow2.f32 %v1382_v56  ;;  %v1201_v60 = vadd.f32 %v1199_v52, %v1198_v58 }
 0x1ef   :  { %v1369_v61 = vmul.f32 -1.442695, %v988_v59 }
 0x1f0   :  { %v1383_v62 = vmul.f32 -1.442695, %v1201_v60  ;;  %v986_v63 = vpop.xlane.xlu0 %985 }
 0x1f1   :  { %1626 = vpow2.f32 %v1369_v61  ;;  %v989_v0 = vadd.f32 %v987_v55, %v986_v63 }
 0x1f2   :  { %1628 = vpow2.f32 %v1383_v62 }
 0x1f3   :  { %v1370_v1 = vmul.f32 -1.442695, %v989_v0 }
 0x1f5   :  { %1630 = vpow2.f32 %v1370_v1 }
 0x1fb   :  { %v1625_v2 = vpop.eup %1624 }
 0x1fc   :  { %v1208_v3 = vadd.f32 1.0, %v1625_v2 }
 0x1fe   :  { %v1627_v4 = vpop.eup %1626  ;;  %1632 = vrcp.f32 %v1208_v3 }
 0x1ff   :  { %v1629_v5 = vpop.eup %1628  ;;  %v996_v6 = vadd.f32 1.0, %v1627_v4 }
 0x200   :  { %v1209_v7 = vadd.f32 1.0, %v1629_v5 }
 0x201   :  { %1634 = vrcp.f32 %v996_v6 }
 0x202   :  { %v1631_v8 = vpop.eup %1630  ;;  %1636 = vrcp.f32 %v1209_v7 }
 0x203   :  { %v997_v9 = vadd.f32 1.0, %v1631_v8 }
 0x205   :  { %1638 = vrcp.f32 %v997_v9 }
 0x20b   :  { %v1633_v10 = vpop.eup %1632 }
 0x20c   :  { %v1214_v11 = vmul.f32 1.442695, %v1633_v10 }
 0x20e   :  { %v1635_v12 = vpop.eup %1634  ;;  %1640 = vpow2.f32 %v1214_v11 }
 0x20f   :  { %v1637_v13 = vpop.eup %1636  ;;  %v1002_v14 = vmul.f32 1.442695, %v1635_v12 }
 0x210   :  { %v1216_v15 = vmul.f32 1.442695, %v1637_v13 }
 0x212   :  { %v1639_v16 = vpop.eup %1638  ;;  %1642 = vpow2.f32 %v1216_v15 }
 0x213   :  { %1644 = vpow2.f32 %v1002_v14  ;;  %v1004_v17 = vmul.f32 1.442695, %v1639_v16 }
 0x215   :  { %1646 = vpow2.f32 %v1004_v17 }
 0x21b   :  { %v1641_v22 = vpop.eup %1640 }
 0x21c   :  { %v1223_v25 = vrot.slane %v1641_v22, %v1012_v21 }
 0x21f   :  { %v1643_v23 = vpop.eup %1642 }
 0x220   :  { %v1645_v24 = vpop.eup %1644  ;;  %v1227_v27 = vrot.slane %v1643_v23, %v1012_v21 }
 0x221   :  { %v1013_v31 = vrot.slane %v1645_v24, %v1012_v21 }
 0x222   :  { %v1647_v28 = vpop.eup %1646  ;;  %v1228_v29 = vsel %vm1018_vm1, %v1227_v27, %v1223_v25 }
 0x223   :  { %v1230_v30 = vsel %vm1021_vm2, %v1228_v29, 0.0  ;;  %v1017_v32 = vrot.slane %v1647_v28, %v1012_v21 }
 0x224   :  { %1231 = vadd.xlane.f32.xlu1 %v1230_v30 }
 0x225   :  { %v1019_v34 = vsel %vm1018_vm1, %v1017_v32, %v1013_v31 }
 0x226   :  { %v1022_v35 = vsel %vm1021_vm2, %v1019_v34, 0.0 }
 0x227   :  { %1023 = vadd.xlane.f32.xlu0 %v1022_v35 }
 0x2ad   :  { %v1232_v39 = vpop.xlane.xlu1 %1231 }
 0x2ae   :  { %1648 = vrcp.f32 %v1232_v39 }
 0x2b0   :  { %v1024_v40 = vpop.xlane.xlu0 %1023 }
 0x2b1   :  { %1650 = vrcp.f32 %v1024_v40 }
 0x2bb   :  { %v1649_v42 = vpop.eup %1648 }
 0x2bc   :  { %v1238_v43 = vrot.slane %v1649_v42, %v1029_v41  ;;  %v1242_v55 = vrot.slane %v1649_v42, %v1033_v44 }
 0x2be   :  { %v1651_v48 = vpop.eup %1650  ;;  %v1245_v49 = vmul.f32 %v1641_v22, %v1238_v43  ;;  %v1246_v56 = vmul.f32 %v1643_v23, %v1242_v55 }
 0x2bf   :  { %v1034_v51 = vrot.slane %v1651_v48, %v1033_v44  ;;  %v1030_v52 = vrot.slane %v1651_v48, %v1029_v41 }
 0x2c0   :  { %1249 = vperm.xlu1 %1535, %v1245_v49  }
 0x2c1   :  { %v1038_v53 = vmul.f32 %v1647_v28, %v1034_v51  ;;  %v1037_v54 = vmul.f32 %v1645_v24, %v1030_v52 }
 0x2c3   :  { %1041 = vperm.xlu0 %1534, %v1037_v54  }
 0x2c4   :  { %1046 = vperm.xlu1 %1535, %v1038_v53  }
 0x2c8   :  { %1254 = vperm.xlu1 %1535, %v1246_v56  }
 0x33b   :  { %v1250_v57 = vpop.permute.xlu1 %1249 }
 0x33c   :  { %v1257_v58 = vmul.f32 %v1250_v57, %v1184_v33 }
 0x33e   :  { %v1259_v59 = vrot.slane %v1257_v58, 4  ;;  %v1042_v60 = vpop.permute.xlu0 %1041 }
 0x33f   :  { %v1047_v61 = vpop.permute.xlu1 %1046  ;;  %v1049_v62 = vmul.f32 %v1042_v60, %v972_v45 }
 0x340   :  { %v1260_v63 = vadd.f32 %v1259_v59, %v1257_v58  ;;  %v1050_v0 = vmul.f32 %v1047_v61, %v973_v50 }
 0x341   :  { %v1051_v1 = vrot.slane %v1049_v62, 4 }
 0x342   :  { %v1057_v2 = vrot.slane %v1050_v0, 4  ;;  %v1261_v5 = vrot.slane %v1260_v63, 2 }
 0x343   :  { %v1052_v3 = vadd.f32 %v1051_v1, %v1049_v62  ;;  %v1255_v4 = vpop.permute.xlu1 %1254 }
 0x344   :  { %v1058_v6 = vadd.f32 %v1057_v2, %v1050_v0  ;;  %v1258_v26 = vmul.f32 %v1255_v4, %v1185_v46  ;;  %v1262_v10 = vadd.f32 %v1261_v5, %v1260_v63 }
 0x345   :  { %v1053_v33 = vrot.slane %v1052_v3, 2 }
 0x346   :  { %v1059_v7 = vrot.slane %v1058_v6, 2  ;;  %v1265_v8 = vrot.slane %v1258_v26, 4  ;;  %v1263_v13 = vrot.slane %v1262_v10, 1 }
 0x347   :  { %v1054_v9 = vadd.f32 %v1053_v33, %v1052_v3 }
 0x348   :  { %v1060_v37 = vadd.f32 %v1059_v7, %v1058_v6  ;;  %v1266_v45 = vadd.f32 %v1265_v8, %v1258_v26  ;;  %v1264_v38 = vadd.f32 %v1263_v13, %v1262_v10 }
 0x349   :  { %v1055_v11 = vrot.slane %v1054_v9, 1 }
 0x34a   :  { %v1061_v12 = vrot.slane %v1060_v37, 1  ;;  %v1267_v47 = vrot.slane %v1266_v45, 2 }
 0x34b   :  { %v1056_v50 = vadd.f32 %v1055_v11, %v1054_v9 }
 0x34c   :  { %v1062_v14 = vadd.f32 %v1061_v12, %v1060_v37  ;;  %v1268_v15 = vadd.f32 %v1267_v47, %v1266_v45 }
 0x34e   :  { %v1065_v16 = vsel %vm1018_vm1, %v1062_v14, %v1056_v50  ;;  %v1269_v17 = vrot.slane %v1268_v15, 1 }
 0x34f   :  { %1067 = vst [vmem:[%s1888_s9] sm:$0x3] %v1065_v16 }
 0x350   :  { %v1270_v46 = vadd.f32 %v1269_v17, %v1268_v15 }
 0x352   :  { %v1273_v18 = vsel %vm1018_vm1, %v1270_v46, %v1264_v38 }
 0x353   :  { %1275 = vst [vmem:[%s1889_s10] sm:$0x3] %v1273_v18 }
 0x354   :  { %1284 = vsyncpa [#allocation3], 1 }
 0x355   :  { %1285 = vsyncpa [#allocation6], 1 }
 0x356   :  { %1286 = vsyncpa [#allocation4], 1 }

// kernel: ranknet_forward.2
= control target key start
LH: loop header
LB: loop body
LE: loop exit
PB: predicated region body
PF: predicated region fallthrough
CT: control target
= control target key end

     0   :  { %16 = vsyncpa [#allocation3], 0  ;;  %s2067_s0 = inlined_call_operand.vmem [shape: f32[16,1280], index: 0, kind: input, shape index: {}]   ;;  %s2068_s1 = inlined_call_operand.vmem [shape: f32[16,128], index: 1, kind: input, shape index: {}]   ;;  %s2069_s2 = inlined_call_operand.vmem [shape: bf16[1280,128], index: 2, kind: input, shape index: {}]   ;;  %s2070_s3 = inlined_call_operand.vmem [shape: f32[1,128], index: 3, kind: input, shape index: {}]   ;;  %s2071_s4 = inlined_call_operand.vmem [shape: f32[1,128], index: 4, kind: input, shape index: {}]   ;;  %s2072_s5 = inlined_call_operand.vmem [shape: bf16[128,128], index: 5, kind: input, shape index: {}]   ;;  %s2073_s6 = inlined_call_operand.vmem [shape: f32[1,128], index: 6, kind: input, shape index: {}]   ;;  %s2074_s7 = inlined_call_operand.vmem [shape: f32[1,128], index: 7, kind: input, shape index: {}]   ;;  %s2075_s8 = inlined_call_operand.vmem [shape: f32[2], index: 8, kind: input, shape index: {}]   ;;  %s2076_s9 = inlined_call_operand.vmem [shape: f32[2,128], index: 9, kind: output, shape index: {0}]   ;;  %s2077_s10 = inlined_call_operand.vmem [shape: f32[2,128], index: 10, kind: output, shape index: {1}]  }
   0x1   :  { %s39_s15 = sshll.u32 %s2075_s8, 4  ;;  %s40_s15 = int_to_ptr.vmem [resolvable:$true] %s39_s15 }
   0x2   :  { %s1602_s16 = scalar_lea.vmem %s40_s15, 16  ;;  %p1607_p1 = scmp.lt.s32.totalorder %s40_s15, %s40_s15 }
   0x3   :  { %p1603_p0 = scmp.ne.s32.totalorder %s40_s15, %s1602_s16  ;;  %p1608_p2 = scmp.lt.s32.totalorder %s1602_s16, %s1602_s16 }
   0x5   :  { %p1609_p3 = por %p1608_p2, %p1607_p1 }
   0x7   :  { %p1610_p4 = pnand %p1609_p3, %p1603_p0 }
   0x9   :  { %1613 = shalt.err (!%p1610_p4)
}
   0xa   :  { %s1616_s17 = smov [#allocation2]  }
   0xb   :  { %42 = dma.vmem_to_smem %s40_s15, 16, %s1616_s17, [#allocation3]  }
   0xc   :  { %1614 = dma.done.wait [#allocation3], 16  }
   0xd   :  { %1615 = vsyncadd [#allocation3], 4294967280 }
   0xe   :  { %46 = sfence }
   0xf   :  { %v1486_v0 = vld [vmem:[%s2069_s2 + $0x78] sm:$0xff]   ;;  %v1490_v4 = vld [vmem:[%s2069_s2 + $0x70] sm:$0xff]   ;;  %v1494_v8 = vld [vmem:[%s2069_s2 + $0x68] sm:$0xff]   ;;  %vm1618_vm0 = vmmov 0   ;;  %vm977_vm1 = vcmask 1041409   ;;  %vm980_vm2 = vcmask 58368  }
  0x10   :  { %v1487_v1 = vld [vmem:[%s2069_s2 + $0xf8] sm:$0xff]   ;;  %1341 = vmatprep.subr.bf16.mxu0 %v1486_v0  ;;  %v1491_v5 = vld [vmem:[%s2069_s2 + $0xf0] sm:$0xff]   ;;  %v1495_v9 = vld [vmem:[%s2069_s2 + $0xe8] sm:$0xff]  }
  0x11   :  { %v1488_v2 = vld [vmem:[%s2069_s2 + $0x38] sm:$0xff]   ;;  %1363 = vmatprep.subr.bf16.mxu1 %v1487_v1  ;;  %v1492_v6 = vld [vmem:[%s2069_s2 + $0x30] sm:$0xff]   ;;  %v1496_v10 = vld [vmem:[%s2069_s2 + $0x28] sm:$0xff]  }
  0x12   :  { %v1489_v3 = vld [vmem:[%s2069_s2 + $0xb8] sm:$0xff]   ;;  %1342 = vmatpush3.bf16.msra.mxu0 %v1488_v2  ;;  %v1493_v7 = vld [vmem:[%s2069_s2 + $0xb0] sm:$0xff]   ;;  %v1497_v11 = vld [vmem:[%s2069_s2 + $0xa8] sm:$0xff]  }
  0x13   :  { %1364 = vmatpush3.bf16.msra.mxu1 %v1489_v3  ;;  %1343 = vmatprep.subr.bf16.mxu0 %v1490_v4  ;;  %v1498_v12 = vld [vmem:[%s2069_s2 + $0x60] sm:$0xff]   ;;  %v1502_v16 = vld [vmem:[%s2069_s2 + $0x58] sm:$0xff]   ;;  %v1506_v20 = vld [vmem:[%s2069_s2 + $0x50] sm:$0xff]  }
  0x14   :  { %1365 = vmatprep.subr.bf16.mxu1 %v1491_v5  ;;  %v1499_v13 = vld [vmem:[%s2069_s2 + $0xe0] sm:$0xff]   ;;  %v1503_v17 = vld [vmem:[%s2069_s2 + $0xd8] sm:$0xff]   ;;  %v1507_v21 = vld [vmem:[%s2069_s2 + $0xd0] sm:$0xff]  }
  0x15   :  { %v1500_v14 = vld [vmem:[%s2069_s2 + $0x20] sm:$0xff]   ;;  %v1504_v18 = vld [vmem:[%s2069_s2 + $0x18] sm:$0xff]   ;;  %v1508_v22 = vld [vmem:[%s2069_s2 + $0x10] sm:$0xff]  }
  0x16   :  { %1344 = vmatpush3.bf16.msra.mxu0 %v1492_v6  ;;  %v1501_v15 = vld [vmem:[%s2069_s2 + $0xa0] sm:$0xff]   ;;  %v1505_v19 = vld [vmem:[%s2069_s2 + $0x98] sm:$0xff]   ;;  %v1509_v23 = vld [vmem:[%s2069_s2 + $0x90] sm:$0xff]  }
  0x17   :  { %1366 = vmatpush3.bf16.msra.mxu1 %v1493_v7  ;;  %1345 = vmatprep.subr.bf16.mxu0 %v1494_v8  ;;  %v1510_v24 = vld [vmem:[%s2069_s2 + $0x48] sm:$0xff]   ;;  %v1514_v28 = vld [vmem:[%s2069_s2 + $0x40] sm:$0xff]   ;;  %v60_v33 = vld [vmem:[%s2067_s0 + $0x58] sm:$0xff] }
  0x18   :  { %1367 = vmatprep.subr.bf16.mxu1 %v1495_v9  ;;  %v1511_v25 = vld [vmem:[%s2069_s2 + $0xc8] sm:$0xff]   ;;  %v1515_v29 = vld [vmem:[%s2069_s2 + $0xc0] sm:$0xff]   ;;  %v52_v34 = vld [vmem:[%s2067_s0 + $0x18] sm:$0xff] }
  0x19   :  { %v1512_v26 = vld [vmem:[%s2069_s2 + $0x8] sm:$0xff]   ;;  %v1516_v30 = vld [vmem:[%s2069_s2] sm:$0xff]   ;;  %v59_v38 = vld [vmem:[%s2067_s0 + $0x50] sm:$0xff] }
  0x1a   :  { %1346 = vmatpush3.bf16.msra.mxu0 %v1496_v10  ;;  %v1513_v27 = vld [vmem:[%s2069_s2 + $0x88] sm:$0xff]   ;;  %v1517_v31 = vld [vmem:[%s2069_s2 + $0x80] sm:$0xff]   ;;  %v51_v41 = vld [vmem:[%s2067_s0 + $0x10] sm:$0xff] }
  0x1b   :  { %1368 = vmatpush3.bf16.msra.mxu1 %v1497_v11  ;;  %1347 = vmatprep.subr.bf16.mxu0 %v1498_v12  ;;  %v50_v32 = vld [vmem:[%s2067_s0 + $0x8] sm:$0xff]  ;;  %v49_v37 = vld [vmem:[%s2067_s0] sm:$0xff]  ;;  %v1518_v44 = vld [vmem:[%s2069_s2 + $0x178] sm:$0xff]  }
  0x1c   :  { %1369 = vmatprep.subr.bf16.mxu1 %v1499_v13  ;;  %v70_v35 = vpack.c.bf16 %v60_v33, %v50_v32  ;;  %v62_v36 = vld [vmem:[%s2067_s0 + $0x68] sm:$0xff]  ;;  %v69_v40 = vpack.c.bf16 %v59_v38, %v49_v37  ;;  %v61_v42 = vld [vmem:[%s2067_s0 + $0x60] sm:$0xff]  ;;  %v1519_v45 = vld [vmem:[%s2069_s2 + $0x1f8] sm:$0xff]  }
  0x1d   :  { %v72_v39 = vpack.c.bf16 %v62_v36, %v52_v34  ;;  %v71_v43 = vpack.c.bf16 %v61_v42, %v51_v41  ;;  %v1520_v46 = vld [vmem:[%s2069_s2 + $0x138] sm:$0xff]   ;;  %v1522_v48 = vld [vmem:[%s2069_s2 + $0x170] sm:$0xff]   ;;  %v1526_v52 = vld [vmem:[%s2069_s2 + $0x168] sm:$0xff]  }
  0x1e   :  { %1348 = vmatpush3.bf16.msra.mxu0 %v1500_v14  ;;  %758 = vmatprep.mubr.bf16.mxu0 %v70_v35  ;;  %v1521_v47 = vld [vmem:[%s2069_s2 + $0x1b8] sm:$0xff]   ;;  %v1523_v49 = vld [vmem:[%s2069_s2 + $0x1f0] sm:$0xff]   ;;  %v1527_v53 = vld [vmem:[%s2069_s2 + $0x1e8] sm:$0xff]  }
  0x1f   :  { %1370 = vmatpush3.bf16.msra.mxu1 %v1501_v15  ;;  %1349 = vmatprep.subr.bf16.mxu0 %v1502_v16  ;;  %v1524_v50 = vld [vmem:[%s2069_s2 + $0x130] sm:$0xff]   ;;  %v1528_v54 = vld [vmem:[%s2069_s2 + $0x128] sm:$0xff]   ;;  %v1530_v56 = vld [vmem:[%s2069_s2 + $0x160] sm:$0xff]  }
  0x20   :  { %1371 = vmatprep.subr.bf16.mxu1 %v1503_v17  ;;  %799 = vmatprep.mubr.bf16.mxu1 %v72_v39  ;;  %v1525_v51 = vld [vmem:[%s2069_s2 + $0x1b0] sm:$0xff]   ;;  %v1529_v55 = vld [vmem:[%s2069_s2 + $0x1a8] sm:$0xff]   ;;  %v1531_v57 = vld [vmem:[%s2069_s2 + $0x1e0] sm:$0xff]  }
  0x21   :  { %v1532_v58 = vld [vmem:[%s2069_s2 + $0x120] sm:$0xff]   ;;  %v1534_v60 = vld [vmem:[%s2069_s2 + $0x158] sm:$0xff]   ;;  %v1538_v0 = vld [vmem:[%s2069_s2 + $0x150] sm:$0xff]  }
  0x22   :  { %1350 = vmatpush3.bf16.msra.mxu0 %v1504_v18  ;;  %v1533_v59 = vld [vmem:[%s2069_s2 + $0x1a0] sm:$0xff]   ;;  %v1535_v61 = vld [vmem:[%s2069_s2 + $0x1d8] sm:$0xff]   ;;  %v1539_v1 = vld [vmem:[%s2069_s2 + $0x1d0] sm:$0xff]  }
  0x23   :  { %1372 = vmatpush3.bf16.msra.mxu1 %v1505_v19  ;;  %1351 = vmatprep.subr.bf16.mxu0 %v1506_v20  ;;  %v1536_v62 = vld [vmem:[%s2069_s2 + $0x118] sm:$0xff]   ;;  %v1540_v2 = vld [vmem:[%s2069_s2 + $0x110] sm:$0xff]   ;;  %v1542_v4 = vld [vmem:[%s2069_s2 + $0x148] sm:$0xff]  }
  0x24   :  { %1373 = vmatprep.subr.bf16.mxu1 %v1507_v21  ;;  %v1537_v63 = vld [vmem:[%s2069_s2 + $0x198] sm:$0xff]   ;;  %v1541_v3 = vld [vmem:[%s2069_s2 + $0x190] sm:$0xff]   ;;  %v1543_v5 = vld [vmem:[%s2069_s2 + $0x1c8] sm:$0xff]  }
  0x25   :  { %v1544_v6 = vld [vmem:[%s2069_s2 + $0x108] sm:$0xff]   ;;  %v1546_v8 = vld [vmem:[%s2069_s2 + $0x140] sm:$0xff]   ;;  %v64_v13 = vld [vmem:[%s2067_s0 + $0x78] sm:$0xff] }
  0x26   :  { %1352 = vmatpush3.bf16.msra.mxu0 %v1508_v22  ;;  %v1545_v7 = vld [vmem:[%s2069_s2 + $0x188] sm:$0xff]   ;;  %v1547_v9 = vld [vmem:[%s2069_s2 + $0x1c0] sm:$0xff]   ;;  %v56_v14 = vld [vmem:[%s2067_s0 + $0x38] sm:$0xff] }
  0x27   :  { %1374 = vmatpush3.bf16.msra.mxu1 %v1509_v23  ;;  %1353 = vmatprep.subr.bf16.mxu0 %v1510_v24  ;;  %v1548_v10 = vld [vmem:[%s2069_s2 + $0x100] sm:$0xff]   ;;  %v54_v12 = vld [vmem:[%s2067_s0 + $0x28] sm:$0xff]  ;;  %v63_v19 = vld [vmem:[%s2067_s0 + $0x70] sm:$0xff]  ;;  %v1617_v23 = vmov 0.0  }
  0x28   :  { %1375 = vmatprep.subr.bf16.mxu1 %v1511_v25  ;;  %v1549_v11 = vld [vmem:[%s2069_s2 + $0x180] sm:$0xff]   ;;  %v66_v15 = vld [vmem:[%s2067_s0 + $0x88] sm:$0xff]  ;;  %v74_v16 = vpack.c.bf16 %v64_v13, %v54_v12  ;;  %v55_v20 = vld [vmem:[%s2067_s0 + $0x30] sm:$0xff] }
  0x29   :  { %v76_v17 = vpack.c.bf16 %v66_v15, %v56_v14  ;;  %v53_v18 = vld [vmem:[%s2067_s0 + $0x20] sm:$0xff]  ;;  %v1550_v25 = vld [vmem:[%s2069_s2 + $0x278] sm:$0xff]   ;;  %v1557_v32 = vld [vmem:[%s2069_s2 + $0x228] sm:$0xff]  }
  0x2a   :  { %1354 = vmatpush3.bf16.msra.mxu0 %v1512_v26  ;;  %v73_v21 = vpack.c.bf16 %v63_v19, %v53_v18  ;;  %v65_v22 = vld [vmem:[%s2067_s0 + $0x80] sm:$0xff]  ;;  %v1551_v26 = vld [vmem:[%s2069_s2 + $0x238] sm:$0xff]   ;;  %v1558_v33 = vld [vmem:[%s2072_s5 + $0x28] sm:$0xff]  }
  0x2b   :  { %1376 = vmatpush3.bf16.msra.mxu1 %v1513_v27  ;;  %1355 = vmatprep.subr.bf16.mxu0 %v1514_v28  ;;  %v75_v24 = vpack.c.bf16 %v65_v22, %v55_v20  ;;  %v1552_v27 = vld [vmem:[%s2072_s5 + $0x38] sm:$0xff]   ;;  %v1553_v28 = vld [vmem:[%s2069_s2 + $0x270] sm:$0xff]   ;;  %v1559_v34 = vld [vmem:[%s2069_s2 + $0x260] sm:$0xff]  }
  0x2c   :  { %1377 = vmatprep.subr.bf16.mxu1 %v1515_v29  ;;  %v1554_v29 = vld [vmem:[%s2069_s2 + $0x230] sm:$0xff]   ;;  %v1560_v35 = vld [vmem:[%s2069_s2 + $0x220] sm:$0xff]   ;;  %v1562_v37 = vld [vmem:[%s2069_s2 + $0x258] sm:$0xff]  }
  0x2d   :  { %v1561_v36 = vld [vmem:[%s2072_s5 + $0x20] sm:$0xff]   ;;  %v1563_v38 = vld [vmem:[%s2069_s2 + $0x218] sm:$0xff]   ;;  %v1566_v41 = vld [vmem:[%s2069_s2 + $0x210] sm:$0xff]  }
  0x2e   :  { %1356 = vmatpush3.bf16.msra.mxu0 %v1516_v30  ;;  %v1555_v30 = vld [vmem:[%s2072_s5 + $0x30] sm:$0xff]   ;;  %v1564_v39 = vld [vmem:[%s2072_s5 + $0x18] sm:$0xff]  }
  0x2f   :  { %1378 = vmatpush3.bf16.msra.mxu1 %v1517_v31  ;;  %1385 = vmatprep.subr.bf16.mxu0 %v1518_v44  ;;  %v1556_v31 = vld [vmem:[%s2069_s2 + $0x268] sm:$0xff]   ;;  %v1567_v42 = vld [vmem:[%s2072_s5 + $0x10] sm:$0xff]  }
  0x30   :  { %1407 = vmatprep.subr.bf16.mxu1 %v1519_v45  ;;  %v1569_v44 = vld [vmem:[%s2069_s2 + $0x208] sm:$0xff]  }
  0x31   :  { %759 = vmatmul.mubr.bf16.vlgmr.msra.gmra.mxu0 %v69_v40  ;;  %v1565_v40 = vld [vmem:[%s2069_s2 + $0x250] sm:$0xff]   ;;  %v58_v45 = vld [vmem:[%s2067_s0 + $0x48] sm:$0xff] }
  0x32   :  { %800 = vmatmul.mubr.bf16.vlgmr.msra.gmra.mxu1 %v71_v43  ;;  %1386 = vmatpush3.bf16.msra.mxu0 %v1520_v46  ;;  %v1568_v43 = vld [vmem:[%s2069_s2 + $0x248] sm:$0xff]   ;;  %v68_v46 = vld [vmem:[%s2067_s0 + $0x98] sm:$0xff] }
  0x33   :  { %1408 = vmatpush3.bf16.msra.mxu1 %v1521_v47  ;;  %1387 = vmatprep.subr.bf16.mxu0 %v1522_v48  ;;  %v1570_v47 = vld [vmem:[%s2072_s5 + $0x8] sm:$0xff]   ;;  %v1571_v48 = vld [vmem:[%s2069_s2 + $0x240] sm:$0xff]  }
  0x34   :  { %1409 = vmatprep.subr.bf16.mxu1 %v1523_v49  ;;  %840 = vmatprep.mubr.bf16.mxu0 %v74_v16  ;;  %v78_v49 = vpack.c.bf16 %v68_v46, %v58_v45 }
  0x35   :  { %881 = vmatprep.mubr.bf16.mxu1 %v76_v17 }
  0x36   :  { %1388 = vmatpush3.bf16.msra.mxu0 %v1524_v50  ;;  %v1572_v50 = vld [vmem:[%s2069_s2 + $0x200] sm:$0xff]  }
  0x37   :  { %1410 = vmatpush3.bf16.msra.mxu1 %v1525_v51  ;;  %1389 = vmatprep.subr.bf16.mxu0 %v1526_v52  ;;  %v57_v51 = vld [vmem:[%s2067_s0 + $0x40] sm:$0xff]  ;;  %v67_v52 = vld [vmem:[%s2067_s0 + $0x90] sm:$0xff] }
  0x38   :  { %1411 = vmatprep.subr.bf16.mxu1 %v1527_v53  ;;  %v1573_v53 = vld [vmem:[%s2072_s5] sm:$0xff]  }
  0x3a   :  { %1390 = vmatpush3.bf16.msra.mxu0 %v1528_v54  ;;  %v1028_v54 = vld [vmem:[%s2068_s1] sm:$0xff] }
  0x3b   :  { %1412 = vmatpush3.bf16.msra.mxu1 %v1529_v55  ;;  %1391 = vmatprep.subr.bf16.mxu0 %v1530_v56  ;;  %v1029_v55 = vld [vmem:[%s2068_s1 + $0x8] sm:$0xff]  ;;  %v77_v56 = vpack.c.bf16 %v67_v52, %v57_v51 }
  0x3c   :  { %1413 = vmatprep.subr.bf16.mxu1 %v1531_v57  ;;  %v1030_v57 = vpack.c.bf16 %v1029_v55, %v1028_v54 }
  0x3e   :  { %1392 = vmatpush3.bf16.msra.mxu0 %v1532_v58 }
  0x3f   :  { %1414 = vmatpush3.bf16.msra.mxu1 %v1533_v59  ;;  %1393 = vmatprep.subr.bf16.mxu0 %v1534_v60 }
  0x40   :  { %1415 = vmatprep.subr.bf16.mxu1 %v1535_v61 }
  0x42   :  { %1394 = vmatpush3.bf16.msra.mxu0 %v1536_v62 }
  0x43   :  { %1416 = vmatpush3.bf16.msra.mxu1 %v1537_v63  ;;  %1395 = vmatprep.subr.bf16.mxu0 %v1538_v0 }
  0x44   :  { %1417 = vmatprep.subr.bf16.mxu1 %v1539_v1 }
  0x46   :  { %1396 = vmatpush3.bf16.msra.mxu0 %v1540_v2 }
  0x47   :  { %1418 = vmatpush3.bf16.msra.mxu1 %v1541_v3  ;;  %1397 = vmatprep.subr.bf16.mxu0 %v1542_v4 }
  0x48   :  { %1419 = vmatprep.subr.bf16.mxu1 %v1543_v5 }
  0x4a   :  { %1398 = vmatpush3.bf16.msra.mxu0 %v1544_v6  ;;  %v1244_v6 = vld [vmem:[%s2070_s3] ss:$0 sm:$0xff] }
  0x4b   :  { %1420 = vmatpush3.bf16.msra.mxu1 %v1545_v7  ;;  %1399 = vmatprep.subr.bf16.mxu0 %v1546_v8 }
  0x4c   :  { %1421 = vmatprep.subr.bf16.mxu1 %v1547_v9 }
  0x4e   :  { %1400 = vmatpush3.bf16.msra.mxu0 %v1548_v10 }
  0x4f   :  { %1422 = vmatpush3.bf16.msra.mxu1 %v1549_v11  ;;  %1429 = vmatprep.subr.bf16.mxu0 %v1550_v25 }
  0x50   :  { %1460 = vmatprep.subr.bf16.mxu1 %v1617_v23 }
  0x51   :  { %841 = vmatmul.mubr.bf16.vlgmr.msra.gmra.mxu0 %v73_v21  ;;  %v1329_v21 = vld [vmem:[%s2073_s6] ss:$0 sm:$0xff] }
  0x52   :  { %882 = vmatmul.mubr.bf16.vlgmr.msra.gmra.mxu1 %v75_v24  ;;  %1430 = vmatpush3.bf16.msra.mxu0 %v1551_v26 }
  0x53   :  { %1476 = vmatprep.mubr.msk.bf16.mxu1 %vm1618_vm0, %v1617_v23  ;;  %1461 = vmatpush3.bf16.msra.mxu1 %v1552_v27 }
  0x54   :  { %1431 = vmatprep.subr.bf16.mxu0 %v1553_v28  ;;  %1462 = vmatprep.subr.bf16.mxu1 %v1617_v23 }
  0x55   :  { %922 = vmatprep.mubr.bf16.mxu0 %v78_v49 }
  0x56   :  { %1432 = vmatpush3.bf16.msra.mxu0 %v1554_v29 }
  0x57   :  { %1463 = vmatpush3.bf16.msra.mxu1 %v1555_v30  ;;  %1433 = vmatprep.subr.bf16.mxu0 %v1556_v31 }
  0x58   :  { %1464 = vmatprep.subr.bf16.mxu1 %v1617_v23 }
  0x5a   :  { %1434 = vmatpush3.bf16.msra.mxu0 %v1557_v32  ;;  %v1338_v32 = vld [vmem:[%s2074_s7] ss:$0 sm:$0xff]  ;;  %s48_s7 = sld [smem:[#allocation2]] }
  0x5b   :  { %1465 = vmatpush3.bf16.msra.mxu1 %v1558_v33  ;;  %1435 = vmatprep.subr.bf16.mxu0 %v1559_v34 }
  0x5c   :  { %1466 = vmatprep.subr.bf16.mxu1 %v1617_v23 }
  0x5e   :  { %1436 = vmatpush3.bf16.msra.mxu0 %v1560_v35 }
  0x5f   :  { %1467 = vmatpush3.bf16.msra.mxu1 %v1561_v36  ;;  %1437 = vmatprep.subr.bf16.mxu0 %v1562_v37 }
  0x60   :  { %1468 = vmatprep.subr.bf16.mxu1 %v1617_v23  ;;  %v946_v55 = vstv %s48_s7 }
  0x62   :  { %1438 = vmatpush3.bf16.msra.mxu0 %v1563_v38 }
  0x63   :  { %1469 = vmatpush3.bf16.msra.mxu1 %v1564_v39  ;;  %1439 = vmatprep.subr.bf16.mxu0 %v1565_v40 }
  0x64   :  { %1470 = vmatprep.subr.bf16.mxu1 %v1617_v23 }
  0x66   :  { %1440 = vmatpush3.bf16.msra.mxu0 %v1566_v41  ;;  %v1325_v41 = vld [vmem:[%s2071_s4] ss:$0 sm:$0xff]  ;;  %s1328_s4 = sld [smem:[#allocation2 + $0x1]] }
  0x67   :  { %1471 = vmatpush3.bf16.msra.mxu1 %v1567_v42  ;;  %1441 = vmatprep.subr.bf16.mxu0 %v1568_v43 }
  0x68   :  { %1472 = vmatprep.subr.bf16.mxu1 %v1617_v23 }
  0x6a   :  { %1442 = vmatpush3.bf16.msra.mxu0 %v1569_v44 }
  0x6b   :  { %1473 = vmatpush3.bf16.msra.mxu1 %v1570_v47  ;;  %1443 = vmatprep.subr.bf16.mxu0 %v1571_v48 }
  0x6c   :  { %1474 = vmatprep.subr.bf16.mxu1 %v1617_v23  ;;  %v1158_v52 = vstv %s1328_s4 }
  0x6e   :  { %1444 = vmatpush3.bf16.msra.mxu0 %v1572_v50 }
  0x6f   :  { %1475 = vmatpush3.bf16.msra.mxu1 %v1573_v53 }
  0x71   :  { %923 = vmatmul.mubr.bf16.vlgmr.msra.gmra.mxu0 %v77_v56 }
  0x72   :  { %1477 = vmatmul.mubr.bf16.vlgmr.msra.gmra.mxu1 %v1030_v57 }
  0xf1   :  { %v1357_v58 = vpop.f32.mrf.mxu0 }
  0xf2   :  { %v1379_v59 = vpop.f32.mrf.mxu1 }
  0xf3   :  { %v1358_v60 = vpop.f32.mrf.mxu0 }
  0xf4   :  { %v1380_v61 = vpop.f32.mrf.mxu1  ;;  %v1359_v5 = vadd.f32 %v1358_v60, %v1357_v58 }
  0xf5   :  { %v1360_v62 = vpop.f32.mrf.mxu0  ;;  %v1381_v11 = vadd.f32 %v1380_v61, %v1379_v59 }
  0xf6   :  { %v1382_v63 = vpop.f32.mrf.mxu1  ;;  %v761_v9 = vadd.f32 %v1359_v5, %v1244_v6 }
  0xf7   :  { %v1361_v0 = vpop.f32.mrf.mxu0 }
  0xf8   :  { %v1383_v2 = vpop.f32.mrf.mxu1  ;;  %v1362_v10 = vadd.f32 %v1361_v0, %v1360_v62  ;;  %v802_v15 = vadd.f32 %v1381_v11, %v761_v9 }
  0xf9   :  { %v1384_v17 = vadd.f32 %v1383_v2, %v1382_v63 }
  0xfa   :  { %v764_v16 = vadd.f32 %v1362_v10, %v1244_v6 }
  0xfc   :  { %v805_v23 = vadd.f32 %v1384_v17, %v764_v16 }
 0x111   :  { %v1401_v1 = vpop.f32.mrf.mxu0 }
 0x112   :  { %v1423_v3 = vpop.f32.mrf.mxu1 }
 0x113   :  { %v1402_v4 = vpop.f32.mrf.mxu0 }
 0x114   :  { %v1424_v7 = vpop.f32.mrf.mxu1  ;;  %v1403_v12 = vadd.f32 %v1402_v4, %v1401_v1 }
 0x115   :  { %v1404_v8 = vpop.f32.mrf.mxu0  ;;  %v1425_v24 = vadd.f32 %v1424_v7, %v1423_v3 }
 0x116   :  { %v1426_v13 = vpop.f32.mrf.mxu1  ;;  %v843_v18 = vadd.f32 %v1403_v12, %v802_v15 }
 0x117   :  { %v1405_v14 = vpop.f32.mrf.mxu0 }
 0x118   :  { %v1406_v19 = vadd.f32 %v1405_v14, %v1404_v8  ;;  %v1427_v20 = vpop.f32.mrf.mxu1  ;;  %v884_v28 = vadd.f32 %v1425_v24, %v843_v18  ;;  %v967_v18 = vlaneseq }
 0x119   :  { %v1428_v35 = vadd.f32 %v1427_v20, %v1426_v13 }
 0x11a   :  { %v846_v29 = vadd.f32 %v1406_v19, %v805_v23  ;;  %v968_v19 = vand.u32 127, %v967_v18  ;;  %v970_v20 = vshrl.u32 %v967_v18, 7 }
 0x11c   :  { %v887_v42 = vadd.f32 %v1428_v35, %v846_v29 }
 0x131   :  { %v1445_v22 = vpop.f32.mrf.mxu0 }
 0x132   :  { %v1136_v25 = vpop.f32.mrf.mxu1 }
 0x133   :  { %v2023_v26 = vadd.f32 %v1329_v21, %v1136_v25  ;;  %v1446_v27 = vpop.f32.mrf.mxu0 }
 0x134   :  { %v1447_v30 = vadd.f32 %v1446_v27, %v1445_v22  ;;  %v1478_v31 = vpop.f32.mrf.mxu1 }
 0x135   :  { %v1143_v33 = vmax.f32 %v2023_v26, 0.0  ;;  %v1448_v34 = vpop.f32.mrf.mxu0 }
 0x136   :  { %v1139_v36 = vpop.f32.mrf.mxu1  ;;  %v2029_v37 = vadd.f32 %v1447_v30, %v884_v28 }
 0x137   :  { %v2031_v38 = vadd.f32 %v1329_v21, %v1139_v36  ;;  %v1449_v39 = vpop.f32.mrf.mxu0  ;;  %v1152_v40 = vmul.f32 %v1338_v32, %v1143_v33  ;;  %v971_v21 = vsub.s32 %v968_v19, %v970_v20  ;;  %v1619_v36 = vmov 0  }
 0x138   :  { %v1450_v43 = vadd.f32 %v1449_v39, %v1448_v34  ;;  %v1479_v44 = vpop.f32.mrf.mxu1  ;;  %v931_v45 = vmax.f32 %v2029_v37, 0.0  ;;  %1485 = vset.pattern.permute.xlu1 %v1619_v36  ;;  %1484 = vset.pattern.permute.xlu0 %v1619_v36 }
 0x139   :  { %v1144_v46 = vmax.f32 %v2031_v38, 0.0  ;;  %1154 = vadd.xlane.f32.xlu1 %v1152_v40  ;;  %v992_v44 = vsub.s32 1, %v970_v20 }
 0x13a   :  { %v2040_v47 = vadd.f32 %v1450_v43, %v887_v42  ;;  %v940_v48 = vmul.f32 %v1325_v41, %v931_v45 }
 0x13b   :  { %v1153_v49 = vmul.f32 %v1338_v32, %v1144_v46 }
 0x13c   :  { %v932_v50 = vmax.f32 %v2040_v47, 0.0  ;;  %942 = vadd.xlane.f32.xlu0 %v940_v48 }
 0x13d   :  { %1156 = vadd.xlane.f32.xlu1 %v1153_v49 }
 0x13e   :  { %v941_v51 = vmul.f32 %v1325_v41, %v932_v50  ;;  %v988_v41 = vsub.s32 0, %v970_v20 }
 0x140   :  { %944 = vadd.xlane.f32.xlu0 %v941_v51 }
 0x1c2   :  { %v1155_v53 = vpop.xlane.xlu1 %1154 }
 0x1c3   :  { %v1159_v54 = vadd.f32 %v1158_v52, %v1155_v53 }
 0x1c5   :  { %v1339_v56 = vmul.f32 -1.442695, %v1159_v54  ;;  %v943_v57 = vpop.xlane.xlu0 %942 }
 0x1c6   :  { %v1157_v58 = vpop.xlane.xlu1 %1156  ;;  %v947_v59 = vadd.f32 %v946_v55, %v943_v57 }
 0x1c7   :  { %1574 = vpow2.f32 %v1339_v56  ;;  %v1160_v60 = vadd.f32 %v1158_v52, %v1157_v58 }
 0x1c8   :  { %v1326_v61 = vmul.f32 -1.442695, %v947_v59 }
 0x1c9   :  { %v1340_v62 = vmul.f32 -1.442695, %v1160_v60  ;;  %v945_v63 = vpop.xlane.xlu0 %944 }
 0x1ca   :  { %1576 = vpow2.f32 %v1326_v61  ;;  %v948_v0 = vadd.f32 %v946_v55, %v945_v63 }
 0x1cb   :  { %1578 = vpow2.f32 %v1340_v62 }
 0x1cc   :  { %v1327_v1 = vmul.f32 -1.442695, %v948_v0 }
 0x1ce   :  { %1580 = vpow2.f32 %v1327_v1 }
 0x1d4   :  { %v1575_v2 = vpop.eup %1574 }
 0x1d5   :  { %v1167_v3 = vadd.f32 1.0, %v1575_v2 }
 0x1d7   :  { %v1577_v4 = vpop.eup %1576  ;;  %1582 = vrcp.f32 %v1167_v3 }
 0x1d8   :  { %v1579_v5 = vpop.eup %1578  ;;  %v955_v6 = vadd.f32 1.0, %v1577_v4 }
 0x1d9   :  { %v1168_v7 = vadd.f32 1.0, %v1579_v5 }
 0x1da   :  { %1584 = vrcp.f32 %v955_v6 }
 0x1db   :  { %v1581_v8 = vpop.eup %1580  ;;  %1586 = vrcp.f32 %v1168_v7 }
 0x1dc   :  { %v956_v9 = vadd.f32 1.0, %v1581_v8 }
 0x1de   :  { %1588 = vrcp.f32 %v956_v9 }
 0x1e4   :  { %v1583_v10 = vpop.eup %1582 }
 0x1e5   :  { %v1173_v11 = vmul.f32 1.442695, %v1583_v10 }
 0x1e7   :  { %v1585_v12 = vpop.eup %1584  ;;  %1590 = vpow2.f32 %v1173_v11 }
 0x1e8   :  { %v1587_v13 = vpop.eup %1586  ;;  %v961_v14 = vmul.f32 1.442695, %v1585_v12 }
 0x1e9   :  { %v1175_v15 = vmul.f32 1.442695, %v1587_v13 }
 0x1eb   :  { %v1589_v16 = vpop.eup %1588  ;;  %1592 = vpow2.f32 %v1175_v15 }
 0x1ec   :  { %1594 = vpow2.f32 %v961_v14  ;;  %v963_v17 = vmul.f32 1.442695, %v1589_v16 }
 0x1ee   :  { %1596 = vpow2.f32 %v963_v17 }
 0x1f4   :  { %v1591_v22 = vpop.eup %1590 }
 0x1f5   :  { %v1182_v25 = vrot.slane %v1591_v22, %v971_v21 }
 0x1f8   :  { %v1593_v23 = vpop.eup %1592 }
 0x1f9   :  { %v1595_v24 = vpop.eup %1594  ;;  %v1186_v27 = vrot.slane %v1593_v23, %v971_v21 }
 0x1fa   :  { %v972_v31 = vrot.slane %v1595_v24, %v971_v21 }
 0x1fb   :  { %v1597_v28 = vpop.eup %1596  ;;  %v1187_v29 = vsel %vm977_vm1, %v1186_v27, %v1182_v25 }
 0x1fc   :  { %v1189_v30 = vsel %vm980_vm2, %v1187_v29, 0.0  ;;  %v976_v32 = vrot.slane %v1597_v28, %v971_v21 }
 0x1fd   :  { %1190 = vadd.xlane.f32.xlu1 %v1189_v30 }
 0x1fe   :  { %v978_v34 = vsel %vm977_vm1, %v976_v32, %v972_v31 }
 0x1ff   :  { %v981_v35 = vsel %vm980_vm2, %v978_v34, 0.0 }
 0x200   :  { %982 = vadd.xlane.f32.xlu0 %v981_v35 }
 0x286   :  { %v1191_v39 = vpop.xlane.xlu1 %1190 }
 0x287   :  { %1598 = vrcp.f32 %v1191_v39 }
 0x289   :  { %v983_v40 = vpop.xlane.xlu0 %982 }
 0x28a   :  { %1600 = vrcp.f32 %v983_v40 }
 0x294   :  { %v1599_v42 = vpop.eup %1598 }
 0x295   :  { %v1197_v43 = vrot.slane %v1599_v42, %v988_v41  ;;  %v1201_v55 = vrot.slane %v1599_v42, %v992_v44 }
 0x297   :  { %v1601_v48 = vpop.eup %1600  ;;  %v1204_v49 = vmul.f32 %v1591_v22, %v1197_v43  ;;  %v1205_v56 = vmul.f32 %v1593_v23, %v1201_v55 }
 0x298   :  { %v993_v51 = vrot.slane %v1601_v48, %v992_v44  ;;  %v989_v52 = vrot.slane %v1601_v48, %v988_v41 }
 0x299   :  { %1208 = vperm.xlu1 %1485, %v1204_v49  }
 0x29a   :  { %v997_v53 = vmul.f32 %v1597_v28, %v993_v51  ;;  %v996_v54 = vmul.f32 %v1595_v24, %v989_v52 }
 0x29c   :  { %1000 = vperm.xlu0 %1484, %v996_v54  }
 0x29d   :  { %1005 = vperm.xlu1 %1485, %v997_v53  }
 0x2a1   :  { %1213 = vperm.xlu1 %1485, %v1205_v56  }
 0x314   :  { %v1209_v57 = vpop.permute.xlu1 %1208 }
 0x315   :  { %v1216_v58 = vmul.f32 %v1209_v57, %v1143_v33 }
 0x317   :  { %v1218_v59 = vrot.slane %v1216_v58, 4  ;;  %v1001_v60 = vpop.permute.xlu0 %1000 }
 0x318   :  { %v1006_v61 = vpop.permute.xlu1 %1005  ;;  %v1008_v62 = vmul.f32 %v1001_v60, %v931_v45 }
 0x319   :  { %v1219_v63 = vadd.f32 %v1218_v59, %v1216_v58  ;;  %v1009_v0 = vmul.f32 %v1006_v61, %v932_v50 }
 0x31a   :  { %v1010_v1 = vrot.slane %v1008_v62, 4 }
 0x31b   :  { %v1016_v2 = vrot.slane %v1009_v0, 4  ;;  %v1220_v5 = vrot.slane %v1219_v63, 2 }
 0x31c   :  { %v1011_v3 = vadd.f32 %v1010_v1, %v1008_v62  ;;  %v1214_v4 = vpop.permute.xlu1 %1213 }
 0x31d   :  { %v1017_v6 = vadd.f32 %v1016_v2, %v1009_v0  ;;  %v1217_v26 = vmul.f32 %v1214_v4, %v1144_v46  ;;  %v1221_v10 = vadd.f32 %v1220_v5, %v1219_v63 }
 0x31e   :  { %v1012_v33 = vrot.slane %v1011_v3, 2 }
 0x31f   :  { %v1018_v7 = vrot.slane %v1017_v6, 2  ;;  %v1224_v8 = vrot.slane %v1217_v26, 4  ;;  %v1222_v13 = vrot.slane %v1221_v10, 1 }
 0x320   :  { %v1013_v9 = vadd.f32 %v1012_v33, %v1011_v3 }
 0x321   :  { %v1019_v37 = vadd.f32 %v1018_v7, %v1017_v6  ;;  %v1225_v45 = vadd.f32 %v1224_v8, %v1217_v26  ;;  %v1223_v38 = vadd.f32 %v1222_v13, %v1221_v10 }
 0x322   :  { %v1014_v11 = vrot.slane %v1013_v9, 1 }
 0x323   :  { %v1020_v12 = vrot.slane %v1019_v37, 1  ;;  %v1226_v47 = vrot.slane %v1225_v45, 2 }
 0x324   :  { %v1015_v50 = vadd.f32 %v1014_v11, %v1013_v9 }
 0x325   :  { %v1021_v14 = vadd.f32 %v1020_v12, %v1019_v37  ;;  %v1227_v15 = vadd.f32 %v1226_v47, %v1225_v45 }
 0x327   :  { %v1024_v16 = vsel %vm977_vm1, %v1021_v14, %v1015_v50  ;;  %v1228_v17 = vrot.slane %v1227_v15, 1 }
 0x328   :  { %1026 = vst [vmem:[%s2076_s9] sm:$0x3] %v1024_v16 }
 0x329   :  { %v1229_v46 = vadd.f32 %v1228_v17, %v1227_v15 }
 0x32b   :  { %v1232_v18 = vsel %vm977_vm1, %v1229_v46, %v1223_v38 }
 0x32c   :  { %1234 = vst [vmem:[%s2077_s10] sm:$0x3] %v1232_v18 }
 0x32d   :  { %1243 = vsyncpa [#allocation3], 1 }

</bundles_post_ra>
